<compile_context>
chip_gen: v7x
topology: tpu7x:2x2x1
jax: 0.10.0
libtpu: 0.0.40
codegen_flags: <defaults>
</compile_context>

<pallas_src>
import jax
import jax.numpy as jnp
from jax.experimental import pallas as pl
from jax.experimental.pallas import tpu as pltpu

LRELU_SLOPE = 0.2
BN_EPS = 1e-5
LANE = 128
TILE_M = 1024   # target rows per grid step (capped so there are >= 2 steps)
TILE_K = 512    # contraction block size (keeps weight tiles small in VMEM)


def _round_up(x, m):
    return ((x + m - 1) // m) * m


# ---------------------------------------------------------------------------
# Kernels
# ---------------------------------------------------------------------------

def _mm_bias_act_kernel(x_ref, w_ref, b_ref, o_ref, acc_ref):
    """o = LeakyReLU(x @ w + b); bf16 operands/stores, f32 accumulation."""
    @pl.when(pl.program_id(1) == 0)
    def _():
        acc_ref[...] = jnp.zeros_like(acc_ref)

    acc_ref[...] += jnp.dot(x_ref[...], w_ref[...],
                            preferred_element_type=jnp.float32)

    @pl.when(pl.program_id(1) == pl.num_programs(1) - 1)
    def _():
        y = acc_ref[...] + b_ref[...]
        o_ref[...] = jnp.where(y > 0, y, LRELU_SLOPE * y).astype(o_ref.dtype)


def _mm_stats_kernel(x_ref, w_ref, y_ref, stats_ref, acc_ref):
    """y = x @ w (pre-BN, bf16 store); per-tile channel (sum, sum-of-sq) in f32.

    Stats are computed from the f32 accumulator, so downcasting y to bf16
    does not affect the BatchNorm statistics.
    """
    @pl.when(pl.program_id(1) == 0)
    def _():
        acc_ref[...] = jnp.zeros_like(acc_ref)

    acc_ref[...] += jnp.dot(x_ref[...], w_ref[...],
                            preferred_element_type=jnp.float32)

    @pl.when(pl.program_id(1) == pl.num_programs(1) - 1)
    def _():
        y = acc_ref[...]
        y_ref[...] = y.astype(y_ref.dtype)
        stats_ref[...] = jnp.concatenate(
            [jnp.sum(y, axis=0, keepdims=True),
             jnp.sum(y * y, axis=0, keepdims=True)], axis=0)


# ---------------------------------------------------------------------------
# XLA-side glue
# ---------------------------------------------------------------------------

def im2col(x, k, s, p):
    """x: (N,H,W,C) bf16 -> (N*OH*OW, k*k*C); patch element order (kh, kw, c)."""
    N, H, W, C = x.shape
    xp = jnp.pad(x, ((0, 0), (p, p), (p, p), (0, 0)))
    OH = (H + 2 * p - k) // s + 1
    OW = (W + 2 * p - k) // s + 1
    cols = []
    for kh in range(k):
        for kw in range(k):
            cols.append(xp[:, kh:kh + s * OH:s, kw:kw + s * OW:s, :])
    cols = jnp.stack(cols, axis=3)                 # (N, OH, OW, k*k, C)
    return cols.reshape(N * OH * OW, k * k * C), (N, OH, OW)


def conv_block(x_nhwc, w_oihw, bias=None, gamma=None, beta=None, *, use_bn):
    """Conv2d(k=4,s=2,p=1) as a tiled im2col matmul.

    use_bn=False: returns LeakyReLU(conv(x) + bias)              (bf16, NHWC)
    use_bn=True : returns (pre-BN conv(x) bf16 NHWC, scale, shift) where
                  scale/shift implement training-mode BatchNorm2d.
    """
    k, s, p = 4, 2, 1
    cout, cin = w_oihw.shape[0], w_oihw.shape[1]

    # bf16 BEFORE im2col (halves the dominant im2col HBM traffic); pad input
    # channels to a multiple of 8 so K = 16*cin_p is a multiple of 128.
    cin_p = _round_up(cin, 8)
    x = x_nhwc.astype(jnp.bfloat16)
    if cin_p != cin:
        x = jnp.pad(x, ((0, 0), (0, 0), (0, 0), (0, cin_p - cin)))

    cols, (N, OH, OW) = im2col(x, k, s, p)
    M, K = cols.shape

    # M tiling: >= 2 grid steps (both TensorCores on v7x), 16-row aligned.
    # For power-of-two M this divides M exactly, so no cols row padding.
    tm = max(16, min(TILE_M, _round_up(-(-M // 2), 16)))
    nt = -(-M // tm)
    Mp = tm * nt
    if Mp != M:
        cols = jnp.pad(cols, ((0, Mp - M), (0, 0)))

    # K tiling keeps the double-buffered weight block small (v7x 64 MiB VMEM).
    nk = -(-K // TILE_K)
    tk = _round_up(-(-K // nk), LANE)
    Kp = tk * nk
    if Kp != K:
        cols = jnp.pad(cols, ((0, 0), (0, Kp - K)))

    # Weight -> (K, Cout): Cin zero-padded, Cout padded to a lane multiple so
    # every kernel store is lane-dense.
    CP = _round_up(cout, LANE)
    w_mat = jnp.transpose(w_oihw, (2, 3, 1, 0))    # (KH, KW, Cin, Cout)
    w_mat = jnp.pad(w_mat, ((0, 0), (0, 0), (0, cin_p - cin), (0, CP - cout)))
    w_mat = w_mat.reshape(16 * cin_p, CP)
    if Kp != K:
        w_mat = jnp.pad(w_mat, ((0, Kp - K), (0, 0)))
    w_mat = w_mat.astype(jnp.bfloat16)

    x_spec = pl.BlockSpec((tm, tk), lambda i, j: (i, j))
    w_spec = pl.BlockSpec((tk, CP), lambda i, j: (j, 0))
    y_spec = pl.BlockSpec((tm, CP), lambda i, j: (i, 0))
    cparams = pltpu.CompilerParams(
        dimension_semantics=("parallel", "arbitrary"))
    acc = pltpu.VMEM((tm, CP), jnp.float32)

    if not use_bn:
        b_pad = jnp.pad(bias, (0, CP - cout)).reshape(1, CP).astype(jnp.float32)
        y = pl.pallas_call(
            _mm_bias_act_kernel,
            out_shape=jax.ShapeDtypeStruct((Mp, CP), jnp.bfloat16),
            grid=(nt, nk),
            in_specs=[x_spec, w_spec, pl.BlockSpec((1, CP), lambda i, j: (0, 0))],
            out_specs=y_spec,
            scratch_shapes=[acc],
            compiler_params=cparams,
        )(cols, w_mat, b_pad)
        return y[:M, :cout].reshape(N, OH, OW, cout)

    # BN layer: single matmul pass -> pre-BN activation + per-tile stats.
    # Conv bias is skipped: BN's mean subtraction cancels a constant bias.
    y, part = pl.pallas_call(
        _mm_stats_kernel,
        out_shape=(jax.ShapeDtypeStruct((Mp, CP), jnp.bfloat16),
                   jax.ShapeDtypeStruct((nt, 2, CP), jnp.float32)),
        grid=(nt, nk),
        in_specs=[x_spec, w_spec],
        out_specs=(y_spec, pl.BlockSpec((None, 2, CP), lambda i, j: (i, 0, 0))),
        scratch_shapes=[acc],
        compiler_params=cparams,
    )(cols, w_mat)

    # Tiny XLA reduction over tiles -> biased batch statistics over the true
    # M = N*OH*OW rows (zero-padded rows/channels contribute nothing).
    tot = jnp.sum(part, axis=0)                    # (2, CP)
    mean = tot[0, :cout] / M
    var = jnp.maximum(tot[1, :cout] / M - mean * mean, 0.0)
    scale = gamma * jax.lax.rsqrt(var + BN_EPS)
    shift = beta - mean * scale
    # TODO(synk): running_mean/running_var momentum updates (training state
    # side effect) are not modeled; forward output is unaffected.
    return y[:M, :cout].reshape(N, OH, OW, cout), scale, shift


def _bn_act(y, scale, shift):
    """BN affine + LeakyReLU in XLA; fuses into the consumer's im2col/flatten."""
    a = y.astype(jnp.float32) * scale + shift
    a = jnp.where(a > 0, a, LRELU_SLOPE * a)
    return a.astype(jnp.bfloat16)


def critic_forward(params, x_nchw):
    x = jnp.transpose(x_nchw, (0, 2, 3, 1))        # NCHW -> NHWC (once)
    p = params["conv0"]
    a = conv_block(x, p["w"], bias=p["b"], use_bn=False)
    for name in ("conv1", "conv2", "conv3"):
        p = params[name]
        y, scale, shift = conv_block(a, p["w"], gamma=p["g"], beta=p["beta"],
                                     use_bn=True)
        a = _bn_act(y, scale, shift)

    # Final Linear(8C*4*4 -> 1): single output lane -> left to XLA.  The FC
    # weight (stored in PyTorch's NCHW flatten order) is permuted once into
    # NHWC-flatten order so the activation needs no transpose.
    N, OH, OW, C8 = a.shape
    x_flat = a.reshape(N, OH * OW * C8).astype(jnp.float32)
    pfc = params["fc"]
    w_fc = pfc["w"].reshape(1, C8, OH, OW)
    w_fc = jnp.transpose(w_fc, (0, 2, 3, 1)).reshape(1, OH * OW * C8)
    return x_flat @ w_fc.T + pfc["b"]              # (N, 1)


def init_params(key, first_conv_size, input_channels):
    C = first_conv_size
    chans = [(input_channels, C), (C, 2 * C), (2 * C, 4 * C), (4 * C, 8 * C)]
    params = {}
    keys = jax.random.split(key, len(chans) + 1)
    for i, (cin, cout) in enumerate(chans):
        w = 0.05 * jax.random.normal(keys[i], (cout, cin, 4, 4), jnp.float32)
        params[f"conv{i}"] = {
            "w": w,
            "b": jnp.zeros((cout,), jnp.float32),
            "g": jnp.ones((cout,), jnp.float32),      # BN weight init
            "beta": jnp.zeros((cout,), jnp.float32),  # BN bias init
        }
    fc_in = 8 * C * 4 * 4
    params["fc"] = {
        "w": 0.05 * jax.random.normal(keys[-1], (1, fc_in), jnp.float32),
        "b": jnp.zeros((1,), jnp.float32),
    }
    return params


if __name__ == "__main__":
    # Spatial size must be 64x64: four stride-2 convs bring it to 4x4, which
    # is what Linear(first_conv_size*8*4*4, 1) expects.
    batch, input_channels, H, W = 2, 3, 64, 64
    first_conv_size = 8

    key = jax.random.PRNGKey(0)
    k_params, k_x = jax.random.split(key)
    params = init_params(k_params, first_conv_size, input_channels)
    x = jax.random.normal(k_x, (batch, input_channels, H, W), jnp.float32)

    out = jax.jit(critic_forward)(params, x)
    out = jax.block_until_ready(out)
    assert out.shape == (batch, 1), out.shape
    assert jnp.all(jnp.isfinite(out))
    print("KERNEL_OK")
</pallas_src>

<mosaic_0001>
module attributes {stable_mosaic.version = 11 : i64} {
  func.func @_mm_bias_act_kernel(%arg0: i32, %arg1: i32, %arg2: memref<1024x128xbf16, #tpu.memory_space<vmem>>, %arg3: memref<128x128xbf16, #tpu.memory_space<vmem>>, %arg4: memref<1x128xf32, #tpu.memory_space<vmem>>, %arg5: memref<1024x128xbf16, #tpu.memory_space<vmem>>, %arg6: memref<1024x128xf32, #tpu.memory_space<vmem>>) attributes {dimension_semantics = [#tpu.dimension_semantics<parallel>, #tpu.dimension_semantics<arbitrary>], iteration_bounds = array<i64: 2, 1>, scalar_prefetch = 0 : i64, scratch_operands = 1 : i64, tpu.core_type = #tpu.core_type<tc>, window_params = [{transform_indices = @transform_0, window_bounds = array<i64: 1024, 128>}, {transform_indices = @transform_1, window_bounds = array<i64: 128, 128>}, {pipeline_mode = #tpu.pipeline_mode<synchronous>, transform_indices = @transform_2, window_bounds = array<i64: 1, 128>}, {transform_indices = @transform_3, window_bounds = array<i64: 1024, 128>}]} {
    %c0_i32 = arith.constant 0 : i32
    %0 = arith.cmpi eq, %arg1, %c0_i32 : i32
    %1 = arith.extui %0 : i1 to i32
    %c0_i32_0 = arith.constant 0 : i32
    %2 = arith.cmpi ne, %1, %c0_i32_0 : i32
    scf.if %2 {
      %cst_10 = arith.constant 0.000000e+00 : f32
      %12 = vector.broadcast %cst_10 : f32 to vector<1024x128xf32>
      %c0_11 = arith.constant 0 : index
      %c0_12 = arith.constant 0 : index
      %13 = vector.load %arg6[%c0_11, %c0_12] : memref<1024x128xf32, #tpu.memory_space<vmem>>, vector<1024x128xf32>
      tpu.vector_store %arg6[%c0_11, %c0_12], %12 {strides = array<i32>} : memref<1024x128xf32, #tpu.memory_space<vmem>>, vector<1024x128xf32>,
    } else {
    }
    %c0 = arith.constant 0 : index
    %c0_1 = arith.constant 0 : index
    %3 = vector.load %arg6[%c0, %c0_1] : memref<1024x128xf32, #tpu.memory_space<vmem>>, vector<1024x128xf32>
    %c0_2 = arith.constant 0 : index
    %c0_3 = arith.constant 0 : index
    %4 = vector.load %arg2[%c0_2, %c0_3] : memref<1024x128xbf16, #tpu.memory_space<vmem>>, vector<1024x128xbf16>
    %c0_4 = arith.constant 0 : index
    %c0_5 = arith.constant 0 : index
    %5 = vector.load %arg3[%c0_4, %c0_5] : memref<128x128xbf16, #tpu.memory_space<vmem>>, vector<128x128xbf16>
    %cst = arith.constant dense<0.000000e+00> : vector<1024x128xf32>
    %6 = tpu.matmul %4, %5, %cst {dimension_numbers = #tpu.dot_dimension_numbers<[1], [0], [0], [1], [0, 0, 1, 1], [], []>} : vector<1024x128xbf16>, vector<128x128xbf16>, vector<1024x128xf32> -> vector<1024x128xf32>
    %7 = arith.addf %3, %6 : vector<1024x128xf32>
    %c0_6 = arith.constant 0 : index
    %c0_7 = arith.constant 0 : index
    %8 = vector.load %arg6[%c0_6, %c0_7] : memref<1024x128xf32, #tpu.memory_space<vmem>>, vector<1024x128xf32>
    tpu.vector_store %arg6[%c0_6, %c0_7], %7 {strides = array<i32>} : memref<1024x128xf32, #tpu.memory_space<vmem>>, vector<1024x128xf32>,
    %c0_i32_8 = arith.constant 0 : i32
    %9 = arith.cmpi eq, %arg1, %c0_i32_8 : i32
    %10 = arith.extui %9 : i1 to i32
    %c0_i32_9 = arith.constant 0 : i32
    %11 = arith.cmpi ne, %10, %c0_i32_9 : i32
    scf.if %11 {
      %c0_10 = arith.constant 0 : index
      %c0_11 = arith.constant 0 : index
      %12 = vector.load %arg6[%c0_10, %c0_11] : memref<1024x128xf32, #tpu.memory_space<vmem>>, vector<1024x128xf32>
      %c0_12 = arith.constant 0 : index
      %c0_13 = arith.constant 0 : index
      %13 = vector.load %arg4[%c0_12, %c0_13] : memref<1x128xf32, #tpu.memory_space<vmem>>, vector<1x128xf32>
      %14 = vector.broadcast %13 : vector<1x128xf32> to vector<1024x128xf32>
      %15 = arith.addf %12, %14 : vector<1024x128xf32>
      %cst_14 = arith.constant 0.000000e+00 : f32
      %16 = vector.broadcast %cst_14 : f32 to vector<1024x128xf32>
      %17 = arith.cmpf ogt, %15, %16 : vector<1024x128xf32>
      %cst_15 = arith.constant 2.000000e-01 : f32
      %18 = vector.broadcast %cst_15 : f32 to vector<1024x128xf32>
      %19 = arith.mulf %18, %15 : vector<1024x128xf32>
      %20 = arith.select %17, %15, %19 : vector<1024x128xi1>, vector<1024x128xf32>
      %21 = arith.truncf %20 : vector<1024x128xf32> to vector<1024x128xbf16>
      %c0_16 = arith.constant 0 : index
      %c0_17 = arith.constant 0 : index
      %22 = vector.load %arg5[%c0_16, %c0_17] : memref<1024x128xbf16, #tpu.memory_space<vmem>>, vector<1024x128xbf16>
      tpu.vector_store %arg5[%c0_16, %c0_17], %21 {strides = array<i32>} : memref<1024x128xbf16, #tpu.memory_space<vmem>>, vector<1024x128xbf16>,
    } else {
    }
    return
  }
  func.func @transform_0(%arg0: i32, %arg1: i32) -> (i32, i32) {
    %c0_i32 = arith.constant 0 : i32
    return %arg0, %arg1 : i32, i32
  }
  func.func @transform_1(%arg0: i32, %arg1: i32) -> (i32, i32) {
    %c0_i32 = arith.constant 0 : i32
    %c0_i32_0 = arith.constant 0 : i32
    return %arg1, %c0_i32 : i32, i32
  }
  func.func @transform_2(%arg0: i32, %arg1: i32) -> (i32, i32) {
    %c0_i32 = arith.constant 0 : i32
    %c0_i32_0 = arith.constant 0 : i32
    %c0_i32_1 = arith.constant 0 : i32
    return %c0_i32, %c0_i32_0 : i32, i32
  }
  func.func @transform_3(%arg0: i32, %arg1: i32) -> (i32, i32) {
    %c0_i32 = arith.constant 0 : i32
    %c0_i32_0 = arith.constant 0 : i32
    return %arg0, %c0_i32 : i32, i32
  }
}

module attributes {stable_mosaic.version = 11 : i64} {
  func.func @_mm_stats_kernel(%arg0: i32, %arg1: i32, %arg2: memref<256x128xbf16, #tpu.memory_space<vmem>>, %arg3: memref<128x128xbf16, #tpu.memory_space<vmem>>, %arg4: memref<256x128xbf16, #tpu.memory_space<vmem>>, %arg5: memref<1x2x128xf32, #tpu.memory_space<vmem>>, %arg6: memref<256x128xf32, #tpu.memory_space<vmem>>) attributes {dimension_semantics = [#tpu.dimension_semantics<parallel>, #tpu.dimension_semantics<arbitrary>], iteration_bounds = array<i64: 2, 1>, scalar_prefetch = 0 : i64, scratch_operands = 1 : i64, tpu.core_type = #tpu.core_type<tc>, window_params = [{transform_indices = @transform_0, window_bounds = array<i64: 256, 128>}, {transform_indices = @transform_1, window_bounds = array<i64: 128, 128>}, {transform_indices = @transform_2, window_bounds = array<i64: 256, 128>}, {transform_indices = @transform_3, window_bounds = array<i64: 1, 2, 128>}]} {
    %c0_i32 = arith.constant 0 : i32
    %0 = arith.cmpi eq, %arg1, %c0_i32 : i32
    %1 = arith.extui %0 : i1 to i32
    %c0_i32_0 = arith.constant 0 : i32
    %2 = arith.cmpi ne, %1, %c0_i32_0 : i32
    scf.if %2 {
      %cst_10 = arith.constant 0.000000e+00 : f32
      %12 = vector.broadcast %cst_10 : f32 to vector<256x128xf32>
      %c0_11 = arith.constant 0 : index
      %c0_12 = arith.constant 0 : index
      %13 = vector.load %arg6[%c0_11, %c0_12] : memref<256x128xf32, #tpu.memory_space<vmem>>, vector<256x128xf32>
      tpu.vector_store %arg6[%c0_11, %c0_12], %12 {strides = array<i32>} : memref<256x128xf32, #tpu.memory_space<vmem>>, vector<256x128xf32>,
    } else {
    }
    %c0 = arith.constant 0 : index
    %c0_1 = arith.constant 0 : index
    %3 = vector.load %arg6[%c0, %c0_1] : memref<256x128xf32, #tpu.memory_space<vmem>>, vector<256x128xf32>
    %c0_2 = arith.constant 0 : index
    %c0_3 = arith.constant 0 : index
    %4 = vector.load %arg2[%c0_2, %c0_3] : memref<256x128xbf16, #tpu.memory_space<vmem>>, vector<256x128xbf16>
    %c0_4 = arith.constant 0 : index
    %c0_5 = arith.constant 0 : index
    %5 = vector.load %arg3[%c0_4, %c0_5] : memref<128x128xbf16, #tpu.memory_space<vmem>>, vector<128x128xbf16>
    %cst = arith.constant dense<0.000000e+00> : vector<256x128xf32>
    %6 = tpu.matmul %4, %5, %cst {dimension_numbers = #tpu.dot_dimension_numbers<[1], [0], [0], [1], [0, 0, 1, 1], [], []>} : vector<256x128xbf16>, vector<128x128xbf16>, vector<256x128xf32> -> vector<256x128xf32>
    %7 = arith.addf %3, %6 : vector<256x128xf32>
    %c0_6 = arith.constant 0 : index
    %c0_7 = arith.constant 0 : index
    %8 = vector.load %arg6[%c0_6, %c0_7] : memref<256x128xf32, #tpu.memory_space<vmem>>, vector<256x128xf32>
    tpu.vector_store %arg6[%c0_6, %c0_7], %7 {strides = array<i32>} : memref<256x128xf32, #tpu.memory_space<vmem>>, vector<256x128xf32>,
    %c0_i32_8 = arith.constant 0 : i32
    %9 = arith.cmpi eq, %arg1, %c0_i32_8 : i32
    %10 = arith.extui %9 : i1 to i32
    %c0_i32_9 = arith.constant 0 : i32
    %11 = arith.cmpi ne, %10, %c0_i32_9 : i32
    scf.if %11 {
      %c0_10 = arith.constant 0 : index
      %c0_11 = arith.constant 0 : index
      %12 = vector.load %arg6[%c0_10, %c0_11] : memref<256x128xf32, #tpu.memory_space<vmem>>, vector<256x128xf32>
      %13 = arith.truncf %12 : vector<256x128xf32> to vector<256x128xbf16>
      %c0_12 = arith.constant 0 : index
      %c0_13 = arith.constant 0 : index
      %14 = vector.load %arg4[%c0_12, %c0_13] : memref<256x128xbf16, #tpu.memory_space<vmem>>, vector<256x128xbf16>
      tpu.vector_store %arg4[%c0_12, %c0_13], %13 {strides = array<i32>} : memref<256x128xbf16, #tpu.memory_space<vmem>>, vector<256x128xbf16>,
      %cst_14 = arith.constant dense<0.000000e+00> : vector<128xf32>
      %15 = vector.multi_reduction <add>, %12, %cst_14 [0] : vector<256x128xf32> to vector<128xf32>
      %16 = vector.shape_cast %15 : vector<128xf32> to vector<1x128xf32>
      %17 = arith.mulf %12, %12 : vector<256x128xf32>
      %cst_15 = arith.constant dense<0.000000e+00> : vector<128xf32>
      %18 = vector.multi_reduction <add>, %17, %cst_15 [0] : vector<256x128xf32> to vector<128xf32>
      %19 = vector.shape_cast %18 : vector<128xf32> to vector<1x128xf32>
      %20 = tpu.concatenate %16, %19 in 0 : vector<1x128xf32>, vector<1x128xf32> -> vector<2x128xf32>
      %c0_16 = arith.constant 0 : index
      %c0_17 = arith.constant 0 : index
      %c0_18 = arith.constant 0 : index
      %21 = vector.load %arg5[%c0_16, %c0_17, %c0_18] : memref<1x2x128xf32, #tpu.memory_space<vmem>>, vector<1x2x128xf32>
      %22 = vector.shape_cast %21 : vector<1x2x128xf32> to vector<2x128xf32>
      %23 = vector.shape_cast %20 : vector<2x128xf32> to vector<1x2x128xf32>
      tpu.vector_store %arg5[%c0_16, %c0_17, %c0_18], %23 {strides = array<i32>} : memref<1x2x128xf32, #tpu.memory_space<vmem>>, vector<1x2x128xf32>,
    } else {
    }
    return
  }
  func.func @transform_0(%arg0: i32, %arg1: i32) -> (i32, i32) {
    %c0_i32 = arith.constant 0 : i32
    return %arg0, %arg1 : i32, i32
  }
  func.func @transform_1(%arg0: i32, %arg1: i32) -> (i32, i32) {
    %c0_i32 = arith.constant 0 : i32
    %c0_i32_0 = arith.constant 0 : i32
    return %arg1, %c0_i32 : i32, i32
  }
  func.func @transform_2(%arg0: i32, %arg1: i32) -> (i32, i32) {
    %c0_i32 = arith.constant 0 : i32
    %c0_i32_0 = arith.constant 0 : i32
    return %arg0, %c0_i32 : i32, i32
  }
  func.func @transform_3(%arg0: i32, %arg1: i32) -> (i32, i32, i32) {
    %c0_i32 = arith.constant 0 : i32
    %c0_i32_0 = arith.constant 0 : i32
    %c0_i32_1 = arith.constant 0 : i32
    return %arg0, %c0_i32, %c0_i32_0 : i32, i32, i32
  }
}

module attributes {stable_mosaic.version = 11 : i64} {
  func.func @_mm_stats_kernel(%arg0: i32, %arg1: i32, %arg2: memref<64x256xbf16, #tpu.memory_space<vmem>>, %arg3: memref<256x128xbf16, #tpu.memory_space<vmem>>, %arg4: memref<64x128xbf16, #tpu.memory_space<vmem>>, %arg5: memref<1x2x128xf32, #tpu.memory_space<vmem>>, %arg6: memref<64x128xf32, #tpu.memory_space<vmem>>) attributes {dimension_semantics = [#tpu.dimension_semantics<parallel>, #tpu.dimension_semantics<arbitrary>], iteration_bounds = array<i64: 2, 1>, scalar_prefetch = 0 : i64, scratch_operands = 1 : i64, tpu.core_type = #tpu.core_type<tc>, window_params = [{transform_indices = @transform_0, window_bounds = array<i64: 64, 256>}, {transform_indices = @transform_1, window_bounds = array<i64: 256, 128>}, {transform_indices = @transform_2, window_bounds = array<i64: 64, 128>}, {transform_indices = @transform_3, window_bounds = array<i64: 1, 2, 128>}]} {
    %c0_i32 = arith.constant 0 : i32
    %0 = arith.cmpi eq, %arg1, %c0_i32 : i32
    %1 = arith.extui %0 : i1 to i32
    %c0_i32_0 = arith.constant 0 : i32
    %2 = arith.cmpi ne, %1, %c0_i32_0 : i32
    scf.if %2 {
      %cst_10 = arith.constant 0.000000e+00 : f32
      %12 = vector.broadcast %cst_10 : f32 to vector<64x128xf32>
      %c0_11 = arith.constant 0 : index
      %c0_12 = arith.constant 0 : index
      %13 = vector.load %arg6[%c0_11, %c0_12] : memref<64x128xf32, #tpu.memory_space<vmem>>, vector<64x128xf32>
      tpu.vector_store %arg6[%c0_11, %c0_12], %12 {strides = array<i32>} : memref<64x128xf32, #tpu.memory_space<vmem>>, vector<64x128xf32>,
    } else {
    }
    %c0 = arith.constant 0 : index
    %c0_1 = arith.constant 0 : index
    %3 = vector.load %arg6[%c0, %c0_1] : memref<64x128xf32, #tpu.memory_space<vmem>>, vector<64x128xf32>
    %c0_2 = arith.constant 0 : index
    %c0_3 = arith.constant 0 : index
    %4 = vector.load %arg2[%c0_2, %c0_3] : memref<64x256xbf16, #tpu.memory_space<vmem>>, vector<64x256xbf16>
    %c0_4 = arith.constant 0 : index
    %c0_5 = arith.constant 0 : index
    %5 = vector.load %arg3[%c0_4, %c0_5] : memref<256x128xbf16, #tpu.memory_space<vmem>>, vector<256x128xbf16>
    %cst = arith.constant dense<0.000000e+00> : vector<64x128xf32>
    %6 = tpu.matmul %4, %5, %cst {dimension_numbers = #tpu.dot_dimension_numbers<[1], [0], [0], [1], [0, 0, 1, 1], [], []>} : vector<64x256xbf16>, vector<256x128xbf16>, vector<64x128xf32> -> vector<64x128xf32>
    %7 = arith.addf %3, %6 : vector<64x128xf32>
    %c0_6 = arith.constant 0 : index
    %c0_7 = arith.constant 0 : index
    %8 = vector.load %arg6[%c0_6, %c0_7] : memref<64x128xf32, #tpu.memory_space<vmem>>, vector<64x128xf32>
    tpu.vector_store %arg6[%c0_6, %c0_7], %7 {strides = array<i32>} : memref<64x128xf32, #tpu.memory_space<vmem>>, vector<64x128xf32>,
    %c0_i32_8 = arith.constant 0 : i32
    %9 = arith.cmpi eq, %arg1, %c0_i32_8 : i32
    %10 = arith.extui %9 : i1 to i32
    %c0_i32_9 = arith.constant 0 : i32
    %11 = arith.cmpi ne, %10, %c0_i32_9 : i32
    scf.if %11 {
      %c0_10 = arith.constant 0 : index
      %c0_11 = arith.constant 0 : index
      %12 = vector.load %arg6[%c0_10, %c0_11] : memref<64x128xf32, #tpu.memory_space<vmem>>, vector<64x128xf32>
      %13 = arith.truncf %12 : vector<64x128xf32> to vector<64x128xbf16>
      %c0_12 = arith.constant 0 : index
      %c0_13 = arith.constant 0 : index
      %14 = vector.load %arg4[%c0_12, %c0_13] : memref<64x128xbf16, #tpu.memory_space<vmem>>, vector<64x128xbf16>
      tpu.vector_store %arg4[%c0_12, %c0_13], %13 {strides = array<i32>} : memref<64x128xbf16, #tpu.memory_space<vmem>>, vector<64x128xbf16>,
      %cst_14 = arith.constant dense<0.000000e+00> : vector<128xf32>
      %15 = vector.multi_reduction <add>, %12, %cst_14 [0] : vector<64x128xf32> to vector<128xf32>
      %16 = vector.shape_cast %15 : vector<128xf32> to vector<1x128xf32>
      %17 = arith.mulf %12, %12 : vector<64x128xf32>
      %cst_15 = arith.constant dense<0.000000e+00> : vector<128xf32>
      %18 = vector.multi_reduction <add>, %17, %cst_15 [0] : vector<64x128xf32> to vector<128xf32>
      %19 = vector.shape_cast %18 : vector<128xf32> to vector<1x128xf32>
      %20 = tpu.concatenate %16, %19 in 0 : vector<1x128xf32>, vector<1x128xf32> -> vector<2x128xf32>
      %c0_16 = arith.constant 0 : index
      %c0_17 = arith.constant 0 : index
      %c0_18 = arith.constant 0 : index
      %21 = vector.load %arg5[%c0_16, %c0_17, %c0_18] : memref<1x2x128xf32, #tpu.memory_space<vmem>>, vector<1x2x128xf32>
      %22 = vector.shape_cast %21 : vector<1x2x128xf32> to vector<2x128xf32>
      %23 = vector.shape_cast %20 : vector<2x128xf32> to vector<1x2x128xf32>
      tpu.vector_store %arg5[%c0_16, %c0_17, %c0_18], %23 {strides = array<i32>} : memref<1x2x128xf32, #tpu.memory_space<vmem>>, vector<1x2x128xf32>,
    } else {
    }
    return
  }
  func.func @transform_0(%arg0: i32, %arg1: i32) -> (i32, i32) {
    %c0_i32 = arith.constant 0 : i32
    return %arg0, %arg1 : i32, i32
  }
  func.func @transform_1(%arg0: i32, %arg1: i32) -> (i32, i32) {
    %c0_i32 = arith.constant 0 : i32
    %c0_i32_0 = arith.constant 0 : i32
    return %arg1, %c0_i32 : i32, i32
  }
  func.func @transform_2(%arg0: i32, %arg1: i32) -> (i32, i32) {
    %c0_i32 = arith.constant 0 : i32
    %c0_i32_0 = arith.constant 0 : i32
    return %arg0, %c0_i32 : i32, i32
  }
  func.func @transform_3(%arg0: i32, %arg1: i32) -> (i32, i32, i32) {
    %c0_i32 = arith.constant 0 : i32
    %c0_i32_0 = arith.constant 0 : i32
    %c0_i32_1 = arith.constant 0 : i32
    return %arg0, %c0_i32, %c0_i32_0 : i32, i32, i32
  }
}

module attributes {stable_mosaic.version = 11 : i64} {
  func.func @_mm_stats_kernel(%arg0: i32, %arg1: i32, %arg2: memref<16x512xbf16, #tpu.memory_space<vmem>>, %arg3: memref<512x128xbf16, #tpu.memory_space<vmem>>, %arg4: memref<16x128xbf16, #tpu.memory_space<vmem>>, %arg5: memref<1x2x128xf32, #tpu.memory_space<vmem>>, %arg6: memref<16x128xf32, #tpu.memory_space<vmem>>) attributes {dimension_semantics = [#tpu.dimension_semantics<parallel>, #tpu.dimension_semantics<arbitrary>], iteration_bounds = array<i64: 2, 1>, scalar_prefetch = 0 : i64, scratch_operands = 1 : i64, tpu.core_type = #tpu.core_type<tc>, window_params = [{transform_indices = @transform_0, window_bounds = array<i64: 16, 512>}, {transform_indices = @transform_1, window_bounds = array<i64: 512, 128>}, {transform_indices = @transform_2, window_bounds = array<i64: 16, 128>}, {transform_indices = @transform_3, window_bounds = array<i64: 1, 2, 128>}]} {
    %c0_i32 = arith.constant 0 : i32
    %0 = arith.cmpi eq, %arg1, %c0_i32 : i32
    %1 = arith.extui %0 : i1 to i32
    %c0_i32_0 = arith.constant 0 : i32
    %2 = arith.cmpi ne, %1, %c0_i32_0 : i32
    scf.if %2 {
      %cst_10 = arith.constant 0.000000e+00 : f32
      %12 = vector.broadcast %cst_10 : f32 to vector<16x128xf32>
      %c0_11 = arith.constant 0 : index
      %c0_12 = arith.constant 0 : index
      %13 = vector.load %arg6[%c0_11, %c0_12] : memref<16x128xf32, #tpu.memory_space<vmem>>, vector<16x128xf32>
      tpu.vector_store %arg6[%c0_11, %c0_12], %12 {strides = array<i32>} : memref<16x128xf32, #tpu.memory_space<vmem>>, vector<16x128xf32>,
    } else {
    }
    %c0 = arith.constant 0 : index
    %c0_1 = arith.constant 0 : index
    %3 = vector.load %arg6[%c0, %c0_1] : memref<16x128xf32, #tpu.memory_space<vmem>>, vector<16x128xf32>
    %c0_2 = arith.constant 0 : index
    %c0_3 = arith.constant 0 : index
    %4 = vector.load %arg2[%c0_2, %c0_3] : memref<16x512xbf16, #tpu.memory_space<vmem>>, vector<16x512xbf16>
    %c0_4 = arith.constant 0 : index
    %c0_5 = arith.constant 0 : index
    %5 = vector.load %arg3[%c0_4, %c0_5] : memref<512x128xbf16, #tpu.memory_space<vmem>>, vector<512x128xbf16>
    %cst = arith.constant dense<0.000000e+00> : vector<16x128xf32>
    %6 = tpu.matmul %4, %5, %cst {dimension_numbers = #tpu.dot_dimension_numbers<[1], [0], [0], [1], [0, 0, 1, 1], [], []>} : vector<16x512xbf16>, vector<512x128xbf16>, vector<16x128xf32> -> vector<16x128xf32>
    %7 = arith.addf %3, %6 : vector<16x128xf32>
    %c0_6 = arith.constant 0 : index
    %c0_7 = arith.constant 0 : index
    %8 = vector.load %arg6[%c0_6, %c0_7] : memref<16x128xf32, #tpu.memory_space<vmem>>, vector<16x128xf32>
    tpu.vector_store %arg6[%c0_6, %c0_7], %7 {strides = array<i32>} : memref<16x128xf32, #tpu.memory_space<vmem>>, vector<16x128xf32>,
    %c0_i32_8 = arith.constant 0 : i32
    %9 = arith.cmpi eq, %arg1, %c0_i32_8 : i32
    %10 = arith.extui %9 : i1 to i32
    %c0_i32_9 = arith.constant 0 : i32
    %11 = arith.cmpi ne, %10, %c0_i32_9 : i32
    scf.if %11 {
      %c0_10 = arith.constant 0 : index
      %c0_11 = arith.constant 0 : index
      %12 = vector.load %arg6[%c0_10, %c0_11] : memref<16x128xf32, #tpu.memory_space<vmem>>, vector<16x128xf32>
      %13 = arith.truncf %12 : vector<16x128xf32> to vector<16x128xbf16>
      %c0_12 = arith.constant 0 : index
      %c0_13 = arith.constant 0 : index
      %14 = vector.load %arg4[%c0_12, %c0_13] : memref<16x128xbf16, #tpu.memory_space<vmem>>, vector<16x128xbf16>
      tpu.vector_store %arg4[%c0_12, %c0_13], %13 {strides = array<i32>} : memref<16x128xbf16, #tpu.memory_space<vmem>>, vector<16x128xbf16>,
      %cst_14 = arith.constant dense<0.000000e+00> : vector<128xf32>
      %15 = vector.multi_reduction <add>, %12, %cst_14 [0] : vector<16x128xf32> to vector<128xf32>
      %16 = vector.shape_cast %15 : vector<128xf32> to vector<1x128xf32>
      %17 = arith.mulf %12, %12 : vector<16x128xf32>
      %cst_15 = arith.constant dense<0.000000e+00> : vector<128xf32>
      %18 = vector.multi_reduction <add>, %17, %cst_15 [0] : vector<16x128xf32> to vector<128xf32>
      %19 = vector.shape_cast %18 : vector<128xf32> to vector<1x128xf32>
      %20 = tpu.concatenate %16, %19 in 0 : vector<1x128xf32>, vector<1x128xf32> -> vector<2x128xf32>
      %c0_16 = arith.constant 0 : index
      %c0_17 = arith.constant 0 : index
      %c0_18 = arith.constant 0 : index
      %21 = vector.load %arg5[%c0_16, %c0_17, %c0_18] : memref<1x2x128xf32, #tpu.memory_space<vmem>>, vector<1x2x128xf32>
      %22 = vector.shape_cast %21 : vector<1x2x128xf32> to vector<2x128xf32>
      %23 = vector.shape_cast %20 : vector<2x128xf32> to vector<1x2x128xf32>
      tpu.vector_store %arg5[%c0_16, %c0_17, %c0_18], %23 {strides = array<i32>} : memref<1x2x128xf32, #tpu.memory_space<vmem>>, vector<1x2x128xf32>,
    } else {
    }
    return
  }
  func.func @transform_0(%arg0: i32, %arg1: i32) -> (i32, i32) {
    %c0_i32 = arith.constant 0 : i32
    return %arg0, %arg1 : i32, i32
  }
  func.func @transform_1(%arg0: i32, %arg1: i32) -> (i32, i32) {
    %c0_i32 = arith.constant 0 : i32
    %c0_i32_0 = arith.constant 0 : i32
    return %arg1, %c0_i32 : i32, i32
  }
  func.func @transform_2(%arg0: i32, %arg1: i32) -> (i32, i32) {
    %c0_i32 = arith.constant 0 : i32
    %c0_i32_0 = arith.constant 0 : i32
    return %arg0, %c0_i32 : i32, i32
  }
  func.func @transform_3(%arg0: i32, %arg1: i32) -> (i32, i32, i32) {
    %c0_i32 = arith.constant 0 : i32
    %c0_i32_0 = arith.constant 0 : i32
    %c0_i32_1 = arith.constant 0 : i32
    return %arg0, %c0_i32, %c0_i32_0 : i32, i32, i32
  }
}

</mosaic_0001>

<bundles_post_ra>
// kernel: critic_forward.4
= control target key start
LH: loop header
LB: loop body
LE: loop exit
PB: predicated region body
PF: predicated region fallthrough
CT: control target
= control target key end

     0   :  { %s4327_s12 = smov 0   ;;  %s4329_s13 = smov 0   ;;  %s4796_s0 = inlined_call_operand.vmem [shape: bf16[2048,128], index: 0, kind: input, shape index: {}]   ;;  %s4797_s1 = inlined_call_operand.vmem [shape: bf16[128,128], index: 1, kind: input, shape index: {}]   ;;  %s4798_s2 = inlined_call_operand.vmem [shape: f32[1,128], index: 2, kind: input, shape index: {}]   ;;  %s4799_s3 = inlined_call_operand.vmem [shape: bf16[2048,128], index: 3, kind: output, shape index: {}]  }
   0x1   :  { %s4331_s14 = smov 0  }
   0x2 LB: > { %s25_s15 = sadd.s32 1, %s4301_s13  ;;  %p3235_p0 = scmp.ge.s32.totalorder %s4305_s14, 1  ;;  %s4305_s14 = sphi %s4331_s14, %s13_s14   ;;  %s4301_s13 = sphi %s4329_s13, %s4801_s13   ;;  %s4297_s12 = sphi %s4327_s12, %s4800_s12  }
   0x3   : > { %p27_p1 = scmp.ge.s32.totalorder %s25_s15, 2  ;;  %p166_p2 = scmp.lt.s32.totalorder %s4305_s14, 3 }
   0x5   : > { %s4803_s15 = smov (%p27_p1, %s25_s15), 0  ;;  %p167_p3 = pnand %p3235_p0, %p166_p2 }
   0x6   : > { %v4210_v0 = vld [vmem:[%s4797_s1] sm:$0xff] (!%p167_p3)   ;;  %s3236_s18 = sshll.u32 (!%p167_p3), %s4297_s12, 7  ;;  %v4211_v1 = vld [vmem:[%s4797_s1 + $0x8] sm:$0xff] (!%p167_p3)   ;;  %v4212_v2 = vld [vmem:[%s4797_s1 + $0x10] sm:$0xff] (!%p167_p3)  }
   0x7   : > { %170 = sbr.rel (%p167_p3) target bundleno = 400 (0x190), region = 32  ;;  %p199_p4 = scmp.lt.s32.totalorder (!%p167_p3), %s3236_s18, 255  ;;  %4026 = vmatprep.subr.bf16.mxu0 (!%p167_p3), %v4210_v0  ;;  %4170 = vmatprep.subr.bf16.mxu1 (!%p167_p3), %v4210_v0  ;;  %v4213_v3 = vld [vmem:[%s4797_s1 + $0x18] sm:$0xff] (!%p167_p3)   ;;  %v4214_v6 = vld [vmem:[%s4797_s1 + $0x20] sm:$0xff] (!%p167_p3)   ;;  %v4215_v7 = vld [vmem:[%s4797_s1 + $0x28] sm:$0xff] (!%p167_p3)  }
   0x8   : > { %4027 = vmatpush3.bf16.msra.mxu0 (!%p167_p3), %v4210_v0  ;;  %4178 = vmatpush3.bf16.msra.mxu1 (!%p167_p3), %v4210_v0  ;;  %v4216_v8 = vld [vmem:[%s4797_s1 + $0x30] sm:$0xff] (!%p167_p3)   ;;  %v4217_v9 = vld [vmem:[%s4797_s1 + $0x38] sm:$0xff] (!%p167_p3)  }
   0x9   : > { %4028 = vmatprep.subr.bf16.mxu0 (!%p167_p3), %v4211_v1  ;;  %4171 = vmatprep.subr.bf16.mxu1 (!%p167_p3), %v4211_v1 }
   0xc   : > { %4029 = vmatpush3.bf16.msra.mxu0 (!%p167_p3), %v4211_v1  ;;  %4179 = vmatpush3.bf16.msra.mxu1 (!%p167_p3), %v4211_v1 }
   0xd   : > { %4030 = vmatprep.subr.bf16.mxu0 (!%p167_p3), %v4212_v2  ;;  %4172 = vmatprep.subr.bf16.mxu1 (!%p167_p3), %v4212_v2 }
   0xe   : > { %s4805_s18 = smov (!%p199_p4, %s3236_s18), 255 }
   0xf   : > { %s3237_s23 = sshll.u32 %s4805_s18, 2 }
  0x10   : > { %s4362_s26 = scalar_lea.vmem %s4796_s0, %s3237_s23  ;;  %4031 = vmatpush3.bf16.msra.mxu0 %v4212_v2  ;;  %4180 = vmatpush3.bf16.msra.mxu1 %v4212_v2  ;;  %s4463_s17 = scalar_lea.vmem %s4799_s3, %s3237_s23 }
  0x11   : > { %v4218_v4 = vld [vmem:[%s4362_s26] sm:$0xff]   ;;  %4032 = vmatprep.subr.bf16.mxu0 %v4213_v3  ;;  %4173 = vmatprep.subr.bf16.mxu1 %v4213_v3  ;;  %v4220_v10 = vld [vmem:[%s4362_s26 + $0x8] sm:$0xff]   ;;  %v4222_v12 = vld [vmem:[%s4362_s26 + $0x10] sm:$0xff]  }
  0x12   : > { %v4219_v5 = vld [vmem:[%s4362_s26 + $0x100] sm:$0xff]   ;;  %4042 = vmatprep.mubr.bf16.mxu0 %v4218_v4  ;;  %v4221_v11 = vld [vmem:[%s4362_s26 + $0x108] sm:$0xff]   ;;  %v4223_v13 = vld [vmem:[%s4362_s26 + $0x110] sm:$0xff]  }
  0x13   : > { %4106 = vmatprep.mubr.bf16.mxu1 %v4219_v5  ;;  %v4224_v14 = vld [vmem:[%s4362_s26 + $0x18] sm:$0xff]   ;;  %v4226_v16 = vld [vmem:[%s4362_s26 + $0x20] sm:$0xff]   ;;  %v4228_v18 = vld [vmem:[%s4362_s26 + $0x28] sm:$0xff]  }
  0x14   : > { %4033 = vmatpush3.bf16.msra.mxu0 %v4213_v3  ;;  %4181 = vmatpush3.bf16.msra.mxu1 %v4213_v3  ;;  %v4225_v15 = vld [vmem:[%s4362_s26 + $0x118] sm:$0xff]   ;;  %v4227_v17 = vld [vmem:[%s4362_s26 + $0x120] sm:$0xff]   ;;  %v4229_v19 = vld [vmem:[%s4362_s26 + $0x128] sm:$0xff]  }
  0x15   : > { %4034 = vmatprep.subr.bf16.mxu0 %v4214_v6  ;;  %4174 = vmatprep.subr.bf16.mxu1 %v4214_v6  ;;  %v4230_v20 = vld [vmem:[%s4362_s26 + $0x30] sm:$0xff]   ;;  %v4232_v22 = vld [vmem:[%s4362_s26 + $0x38] sm:$0xff]   ;;  %v4234_v24 = vld [vmem:[%s4362_s26 + $0x40] sm:$0xff]  }
  0x16   : > { %v4231_v21 = vld [vmem:[%s4362_s26 + $0x130] sm:$0xff]   ;;  %v4233_v23 = vld [vmem:[%s4362_s26 + $0x138] sm:$0xff]   ;;  %v4235_v25 = vld [vmem:[%s4362_s26 + $0x140] sm:$0xff]  }
  0x17   : > { %v4236_v26 = vld [vmem:[%s4362_s26 + $0x48] sm:$0xff]   ;;  %v4238_v28 = vld [vmem:[%s4362_s26 + $0x50] sm:$0xff]   ;;  %v4240_v30 = vld [vmem:[%s4362_s26 + $0x58] sm:$0xff]  }
  0x18   : > { %4035 = vmatpush3.bf16.msra.mxu0 %v4214_v6  ;;  %4182 = vmatpush3.bf16.msra.mxu1 %v4214_v6  ;;  %v4237_v27 = vld [vmem:[%s4362_s26 + $0x148] sm:$0xff]   ;;  %v4239_v29 = vld [vmem:[%s4362_s26 + $0x150] sm:$0xff]   ;;  %v4241_v31 = vld [vmem:[%s4362_s26 + $0x158] sm:$0xff]  }
  0x19   : > { %4036 = vmatprep.subr.bf16.mxu0 %v4215_v7  ;;  %4175 = vmatprep.subr.bf16.mxu1 %v4215_v7  ;;  %v4242_v32 = vld [vmem:[%s4362_s26 + $0x60] sm:$0xff]   ;;  %v4244_v34 = vld [vmem:[%s4362_s26 + $0x68] sm:$0xff]   ;;  %v4246_v36 = vld [vmem:[%s4362_s26 + $0x70] sm:$0xff]  }
  0x1a   : > { %v4243_v33 = vld [vmem:[%s4362_s26 + $0x160] sm:$0xff]   ;;  %v4245_v35 = vld [vmem:[%s4362_s26 + $0x168] sm:$0xff]   ;;  %v4247_v37 = vld [vmem:[%s4362_s26 + $0x170] sm:$0xff]  }
  0x1b   : > { %v4248_v38 = vld [vmem:[%s4362_s26 + $0x78] sm:$0xff]   ;;  %v4250_v40 = vld [vmem:[%s4362_s26 + $0x80] sm:$0xff]   ;;  %v4252_v42 = vld [vmem:[%s4362_s26 + $0x88] sm:$0xff]  }
  0x1c   : > { %4037 = vmatpush3.bf16.msra.mxu0 %v4215_v7  ;;  %4183 = vmatpush3.bf16.msra.mxu1 %v4215_v7  ;;  %v4249_v39 = vld [vmem:[%s4362_s26 + $0x178] sm:$0xff]   ;;  %v4251_v41 = vld [vmem:[%s4362_s26 + $0x180] sm:$0xff]   ;;  %v4253_v43 = vld [vmem:[%s4362_s26 + $0x188] sm:$0xff]  }
  0x1d   : > { %4038 = vmatprep.subr.bf16.mxu0 %v4216_v8  ;;  %4176 = vmatprep.subr.bf16.mxu1 %v4216_v8  ;;  %v4254_v44 = vld [vmem:[%s4362_s26 + $0x90] sm:$0xff]   ;;  %v4256_v46 = vld [vmem:[%s4362_s26 + $0x98] sm:$0xff]   ;;  %v4258_v48 = vld [vmem:[%s4362_s26 + $0xa0] sm:$0xff]  }
  0x1e   : > { %v4255_v45 = vld [vmem:[%s4362_s26 + $0x190] sm:$0xff]   ;;  %v4257_v47 = vld [vmem:[%s4362_s26 + $0x198] sm:$0xff]   ;;  %v4259_v49 = vld [vmem:[%s4362_s26 + $0x1a0] sm:$0xff]  }
  0x1f   : > { %v4260_v50 = vld [vmem:[%s4362_s26 + $0xa8] sm:$0xff]   ;;  %v4262_v52 = vld [vmem:[%s4362_s26 + $0xb0] sm:$0xff]   ;;  %v4264_v54 = vld [vmem:[%s4362_s26 + $0xb8] sm:$0xff]  }
  0x20   : > { %4039 = vmatpush3.bf16.msra.mxu0 %v4216_v8  ;;  %4184 = vmatpush3.bf16.msra.mxu1 %v4216_v8  ;;  %v4261_v51 = vld [vmem:[%s4362_s26 + $0x1a8] sm:$0xff]   ;;  %v4263_v53 = vld [vmem:[%s4362_s26 + $0x1b0] sm:$0xff]   ;;  %v4265_v55 = vld [vmem:[%s4362_s26 + $0x1b8] sm:$0xff]  }
  0x21   : > { %4040 = vmatprep.subr.bf16.mxu0 %v4217_v9  ;;  %4177 = vmatprep.subr.bf16.mxu1 %v4217_v9  ;;  %v4266_v56 = vld [vmem:[%s4362_s26 + $0xc0] sm:$0xff]   ;;  %v4268_v58 = vld [vmem:[%s4362_s26 + $0xc8] sm:$0xff]   ;;  %v4270_v60 = vld [vmem:[%s4362_s26 + $0xd0] sm:$0xff]  }
  0x22   : > { %v4267_v57 = vld [vmem:[%s4362_s26 + $0x1c0] sm:$0xff]   ;;  %v4269_v59 = vld [vmem:[%s4362_s26 + $0x1c8] sm:$0xff]   ;;  %v4271_v61 = vld [vmem:[%s4362_s26 + $0x1d0] sm:$0xff]  }
  0x23   : > { %v4272_v62 = vld [vmem:[%s4362_s26 + $0xd8] sm:$0xff]   ;;  %v4274_v0 = vld [vmem:[%s4362_s26 + $0xe0] sm:$0xff]   ;;  %v4276_v2 = vld [vmem:[%s4362_s26 + $0xe8] sm:$0xff]  }
  0x24   : > { %4041 = vmatpush3.bf16.msra.mxu0 %v4217_v9  ;;  %4185 = vmatpush3.bf16.msra.mxu1 %v4217_v9  ;;  %v4273_v63 = vld [vmem:[%s4362_s26 + $0x1d8] sm:$0xff]   ;;  %v4275_v1 = vld [vmem:[%s4362_s26 + $0x1e0] sm:$0xff]   ;;  %v4277_v3 = vld [vmem:[%s4362_s26 + $0x1e8] sm:$0xff]  }
  0x25   : > { %v4278_v4 = vld [vmem:[%s4362_s26 + $0xf0] sm:$0xff]   ;;  %v4280_v6 = vld [vmem:[%s4362_s26 + $0xf8] sm:$0xff]   ;;  %v4446_v8 = vld [vmem:[%s4798_s2] ss:$0 sm:$0xff] }
  0x26   : > { %v4279_v5 = vld [vmem:[%s4362_s26 + $0x1f0] sm:$0xff]   ;;  %v4281_v7 = vld [vmem:[%s4362_s26 + $0x1f8] sm:$0xff]  }
  0x27   : > { %4043 = vmatmul.mubr.bf16.vlgmr.msra.gmra.mrb[0].mxu0 %v4220_v10  ;;  %4107 = vmatmul.mubr.bf16.vlgmr.msra.gmra.mrb[0].mxu1 %v4221_v11 }
  0x28   : > { %4046 = vmatprep.mubr.bf16.mxu0 %v4222_v12  ;;  %4110 = vmatprep.mubr.bf16.mxu1 %v4223_v13 }
  0x2f   : > { %4047 = vmatmul.mubr.bf16.gmra.mrb[4].mxu0 %v4224_v14  ;;  %4111 = vmatmul.mubr.bf16.gmra.mrb[4].mxu1 %v4225_v15 }
  0x30   : > { %4050 = vmatprep.mubr.bf16.mxu0 %v4226_v16  ;;  %4114 = vmatprep.mubr.bf16.mxu1 %v4227_v17 }
  0x37   : > { %4051 = vmatmul.mubr.bf16.gmra.mrb[8].mxu0 %v4228_v18  ;;  %4115 = vmatmul.mubr.bf16.gmra.mrb[8].mxu1 %v4229_v19 }
  0x38   : > { %4054 = vmatprep.mubr.bf16.mxu0 %v4230_v20  ;;  %4118 = vmatprep.mubr.bf16.mxu1 %v4231_v21 }
  0x3f   : > { %4055 = vmatmul.mubr.bf16.gmra.mrb[12].mxu0 %v4232_v22  ;;  %4119 = vmatmul.mubr.bf16.gmra.mrb[12].mxu1 %v4233_v23 }
  0x40   : > { %4058 = vmatprep.mubr.bf16.mxu0 %v4234_v24  ;;  %4122 = vmatprep.mubr.bf16.mxu1 %v4235_v25 }
  0x47   : > { %4059 = vmatmul.mubr.bf16.gmra.mrb[16].mxu0 %v4236_v26  ;;  %4123 = vmatmul.mubr.bf16.gmra.mrb[16].mxu1 %v4237_v27 }
  0x48   : > { %4062 = vmatprep.mubr.bf16.mxu0 %v4238_v28  ;;  %4126 = vmatprep.mubr.bf16.mxu1 %v4239_v29 }
  0x4f   : > { %4063 = vmatmul.mubr.bf16.gmra.mrb[20].mxu0 %v4240_v30  ;;  %4127 = vmatmul.mubr.bf16.gmra.mrb[20].mxu1 %v4241_v31 }
  0x50   : > { %4066 = vmatprep.mubr.bf16.mxu0 %v4242_v32  ;;  %4130 = vmatprep.mubr.bf16.mxu1 %v4243_v33 }
  0x57   : > { %4067 = vmatmul.mubr.bf16.gmra.mrb[24].mxu0 %v4244_v34  ;;  %4131 = vmatmul.mubr.bf16.gmra.mrb[24].mxu1 %v4245_v35 }
  0x58   : > { %4070 = vmatprep.mubr.bf16.mxu0 %v4246_v36  ;;  %4134 = vmatprep.mubr.bf16.mxu1 %v4247_v37 }
  0x5f   : > { %4071 = vmatmul.mubr.bf16.gmra.mrb[28].mxu0 %v4248_v38  ;;  %4135 = vmatmul.mubr.bf16.gmra.mrb[28].mxu1 %v4249_v39 }
  0x60   : > { %4074 = vmatprep.mubr.bf16.mxu0 %v4250_v40  ;;  %4138 = vmatprep.mubr.bf16.mxu1 %v4251_v41 }
  0x67   : > { %4075 = vmatmul.mubr.bf16.gmra.mrb[32].mxu0 %v4252_v42  ;;  %4139 = vmatmul.mubr.bf16.gmra.mrb[32].mxu1 %v4253_v43 }
  0x68   : > { %4078 = vmatprep.mubr.bf16.mxu0 %v4254_v44  ;;  %4142 = vmatprep.mubr.bf16.mxu1 %v4255_v45 }
  0x6f   : > { %4079 = vmatmul.mubr.bf16.gmra.mrb[36].mxu0 %v4256_v46  ;;  %4143 = vmatmul.mubr.bf16.gmra.mrb[36].mxu1 %v4257_v47 }
  0x70   : > { %4082 = vmatprep.mubr.bf16.mxu0 %v4258_v48  ;;  %4146 = vmatprep.mubr.bf16.mxu1 %v4259_v49 }
  0x77   : > { %4083 = vmatmul.mubr.bf16.gmra.mrb[40].mxu0 %v4260_v50  ;;  %4147 = vmatmul.mubr.bf16.gmra.mrb[40].mxu1 %v4261_v51 }
  0x78   : > { %4086 = vmatprep.mubr.bf16.mxu0 %v4262_v52  ;;  %4150 = vmatprep.mubr.bf16.mxu1 %v4263_v53 }
  0x7f   : > { %4087 = vmatmul.mubr.bf16.gmra.mrb[44].mxu0 %v4264_v54  ;;  %4151 = vmatmul.mubr.bf16.gmra.mrb[44].mxu1 %v4265_v55 }
  0x80   : > { %4090 = vmatprep.mubr.bf16.mxu0 %v4266_v56  ;;  %4154 = vmatprep.mubr.bf16.mxu1 %v4267_v57 }
  0x87   : > { %4091 = vmatmul.mubr.bf16.gmra.mrb[48].mxu0 %v4268_v58  ;;  %4155 = vmatmul.mubr.bf16.gmra.mrb[48].mxu1 %v4269_v59 }
  0x88   : > { %4094 = vmatprep.mubr.bf16.mxu0 %v4270_v60  ;;  %4158 = vmatprep.mubr.bf16.mxu1 %v4271_v61 }
  0x8f   : > { %4095 = vmatmul.mubr.bf16.gmra.mrb[52].mxu0 %v4272_v62  ;;  %4159 = vmatmul.mubr.bf16.gmra.mrb[52].mxu1 %v4273_v63 }
  0x90   : > { %4098 = vmatprep.mubr.bf16.mxu0 %v4274_v0  ;;  %4162 = vmatprep.mubr.bf16.mxu1 %v4275_v1 }
  0x97   : > { %4099 = vmatmul.mubr.bf16.gmra.mrb[56].mxu0 %v4276_v2  ;;  %4163 = vmatmul.mubr.bf16.gmra.mrb[56].mxu1 %v4277_v3 }
  0x98   : > { %4102 = vmatprep.mubr.bf16.mxu0 %v4278_v4  ;;  %4166 = vmatprep.mubr.bf16.mxu1 %v4279_v5 }
  0x9f   : > { %4103 = vmatmul.mubr.bf16.gmra.mrb[60].mxu0 %v4280_v6  ;;  %4167 = vmatmul.mubr.bf16.gmra.mrb[60].mxu1 %v4281_v7 }
  0xfa   : > { %v4044_v9 = vpop.f32.mrb[0].mxu0  ;;  %v4108_v10 = vpop.f32.mrb[0].mxu1 }
  0xfb   : > { %v1997_v11 = vadd.f32 %v4044_v9, %v4446_v8  ;;  %v2061_v12 = vadd.f32 %v4108_v10, %v4446_v8  ;;  %v1090_v13 = vpop.f32.mrb[1].mxu0  ;;  %v1346_v14 = vpop.f32.mrb[1].mxu1 }
  0xfc   : > { %v1995_v15 = vadd.f32 %v4446_v8, %v1090_v13  ;;  %v2059_v16 = vadd.f32 %v4446_v8, %v1346_v14  ;;  %v4045_v17 = vpop.f32.mrb[2].mxu0  ;;  %v4109_v18 = vpop.f32.mrb[2].mxu1 }
  0xfd   : > { %vm2125_vm0 = vcmp.gt.f32.partialorder %v1997_v11, 0.0  ;;  %v2253_v19 = vmul.f32 0.2, %v1997_v11  ;;  %vm2189_vm1 = vcmp.gt.f32.partialorder %v2061_v12, 0.0  ;;  %v2317_v20 = vmul.f32 0.2, %v2061_v12 }
  0xfe   : > { %vm2123_vm2 = vcmp.gt.f32.partialorder %v1995_v15, 0.0  ;;  %v2251_v21 = vmul.f32 0.2, %v1995_v15  ;;  %vm2187_vm3 = vcmp.gt.f32.partialorder %v2059_v16, 0.0  ;;  %v2315_v22 = vmul.f32 0.2, %v2059_v16 }
  0xff   : > { %v1998_v23 = vadd.f32 %v4045_v17, %v4446_v8  ;;  %v2062_v24 = vadd.f32 %v4109_v18, %v4446_v8  ;;  %v1093_v25 = vpop.f32.mrb[3].mxu0  ;;  %v1349_v26 = vpop.f32.mrb[3].mxu1  ;;  %v2381_v27 = vsel %vm2125_vm0, %v1997_v11, %v2253_v19  ;;  %v2445_v28 = vsel %vm2189_vm1, %v2061_v12, %v2317_v20 }
 0x100   : > { %v1996_v29 = vadd.f32 %v4446_v8, %v1093_v25  ;;  %v2060_v30 = vadd.f32 %v4446_v8, %v1349_v26  ;;  %v2379_v35 = vsel %vm2123_vm2, %v1995_v15, %v2251_v21  ;;  %v2443_v36 = vsel %vm2187_vm3, %v2059_v16, %v2315_v22 }
 0x101   : > { %vm2126_vm4 = vcmp.gt.f32.partialorder %v1998_v23, 0.0  ;;  %v2254_v31 = vmul.f32 0.2, %v1998_v23  ;;  %vm2190_vm5 = vcmp.gt.f32.partialorder %v2062_v24, 0.0  ;;  %v2318_v32 = vmul.f32 0.2, %v2062_v24 }
 0x102   : > { %vm2124_vm6 = vcmp.gt.f32.partialorder %v1996_v29, 0.0  ;;  %v2252_v33 = vmul.f32 0.2, %v1996_v29  ;;  %vm2188_vm7 = vcmp.gt.f32.partialorder %v2060_v30, 0.0  ;;  %v2316_v34 = vmul.f32 0.2, %v2060_v30 }
 0x103   : > { %v2382_v37 = vsel %vm2126_vm4, %v1998_v23, %v2254_v31  ;;  %v2446_v38 = vsel %vm2190_vm5, %v2062_v24, %v2318_v32  ;;  %v4048_v39 = vpop.f32.mrb[4].mxu0  ;;  %v4112_v40 = vpop.f32.mrb[4].mxu1 }
 0x104   : > { %v3579_v41 = vpack.c.bf16 %v2382_v37, %v2381_v27  ;;  %v3739_v42 = vpack.c.bf16 %v2446_v38, %v2445_v28  ;;  %v2380_v43 = vsel %vm2124_vm6, %v1996_v29, %v2252_v33  ;;  %v2444_v44 = vsel %vm2188_vm7, %v2060_v30, %v2316_v34  ;;  %v1106_v45 = vpop.f32.mrb[5].mxu0  ;;  %v1362_v46 = vpop.f32.mrb[5].mxu1 }
 0x105   : > { %v3574_v47 = vpack.c.bf16 %v2380_v43, %v2379_v35  ;;  %v3734_v48 = vpack.c.bf16 %v2444_v44, %v2443_v36  ;;  %v2001_v49 = vadd.f32 %v4048_v39, %v4446_v8  ;;  %v2065_v50 = vadd.f32 %v4112_v40, %v4446_v8  ;;  %v4049_v51 = vpop.f32.mrb[6].mxu0  ;;  %v4113_v52 = vpop.f32.mrb[6].mxu1 }
 0x106   : > { %3891 = vst [vmem:[%s4463_s17 + $0x8] sm:$0xff] %v3579_v41   ;;  %3923 = vst [vmem:[%s4463_s17 + $0x108] sm:$0xff] %v3739_v42   ;;  %v1999_v53 = vadd.f32 %v4446_v8, %v1106_v45  ;;  %v2063_v54 = vadd.f32 %v4446_v8, %v1362_v46  ;;  %v2002_v55 = vadd.f32 %v4049_v51, %v4446_v8  ;;  %v1109_v57 = vpop.f32.mrb[7].mxu0  ;;  %v1365_v58 = vpop.f32.mrb[7].mxu1 }
 0x107   : > { %v2066_v56 = vadd.f32 %v4113_v52, %v4446_v8  ;;  %3575 = vst [vmem:[%s4463_s17] sm:$0xff] %v3574_v47   ;;  %3922 = vst [vmem:[%s4463_s17 + $0x100] sm:$0xff] %v3734_v48   ;;  %vm2129_vm8 = vcmp.gt.f32.partialorder %v2001_v49, 0.0  ;;  %v2257_v59 = vmul.f32 0.2, %v2001_v49  ;;  %vm2193_vm9 = vcmp.gt.f32.partialorder %v2065_v50, 0.0 }
 0x108   : > { %v2321_v60 = vmul.f32 0.2, %v2065_v50  ;;  %vm2127_vm10 = vcmp.gt.f32.partialorder %v1999_v53, 0.0  ;;  %v2255_v61 = vmul.f32 0.2, %v1999_v53  ;;  %vm2191_vm11 = vcmp.gt.f32.partialorder %v2063_v54, 0.0 }
 0x109   : > { %v2319_v62 = vmul.f32 0.2, %v2063_v54  ;;  %v2385_v63 = vsel %vm2129_vm8, %v2001_v49, %v2257_v59  ;;  %vm2130_vm12 = vcmp.gt.f32.partialorder %v2002_v55, 0.0  ;;  %v2258_v1 = vmul.f32 0.2, %v2002_v55 }
 0x10a   : > { %v2449_v0 = vsel %vm2193_vm9, %v2065_v50, %v2321_v60  ;;  %v2383_v2 = vsel %vm2127_vm10, %v1999_v53, %v2255_v61  ;;  %vm2194_vm13 = vcmp.gt.f32.partialorder %v2066_v56, 0.0  ;;  %v2322_v4 = vmul.f32 0.2, %v2066_v56  ;;  %v4052_v5 = vpop.f32.mrb[8].mxu0  ;;  %v4116_v6 = vpop.f32.mrb[8].mxu1 }
 0x10b   : > { %v2447_v3 = vsel %vm2191_vm11, %v2063_v54, %v2319_v62  ;;  %v2386_v7 = vsel %vm2130_vm12, %v2002_v55, %v2258_v1  ;;  %v2000_v9 = vadd.f32 %v4446_v8, %v1109_v57  ;;  %v2064_v10 = vadd.f32 %v4446_v8, %v1365_v58  ;;  %v1122_v12 = vpop.f32.mrb[9].mxu0  ;;  %v1378_v13 = vpop.f32.mrb[9].mxu1 }
 0x10c   : > { %v2005_v11 = vadd.f32 %v4052_v5, %v4446_v8  ;;  %v3589_v14 = vpack.c.bf16 %v2386_v7, %v2385_v63  ;;  %v2450_v15 = vsel %vm2194_vm13, %v2066_v56, %v2322_v4  ;;  %v2069_v16 = vadd.f32 %v4116_v6, %v4446_v8  ;;  %v4053_v18 = vpop.f32.mrb[10].mxu0  ;;  %v4117_v19 = vpop.f32.mrb[10].mxu1 }
 0x10d   : > { %v2003_v17 = vadd.f32 %v4446_v8, %v1122_v12  ;;  %v3749_v20 = vpack.c.bf16 %v2450_v15, %v2449_v0  ;;  %vm2128_vm14 = vcmp.gt.f32.partialorder %v2000_v9, 0.0  ;;  %v2256_v21 = vmul.f32 0.2, %v2000_v9  ;;  %v1125_v22 = vpop.f32.mrb[11].mxu0  ;;  %v1381_v23 = vpop.f32.mrb[11].mxu1 }
 0x10e   : > { %vm2192_vm15 = vcmp.gt.f32.partialorder %v2064_v10, 0.0  ;;  %3893 = vst [vmem:[%s4463_s17 + $0x18] sm:$0xff] %v3589_v14   ;;  %v2320_v24 = vmul.f32 0.2, %v2064_v10  ;;  %vm2133_vm0 = vcmp.gt.f32.partialorder %v2005_v11, 0.0  ;;  %vm2197_vm1 = vcmp.gt.f32.partialorder %v2069_v16, 0.0 }
 0x10f   : > { %v2261_v25 = vmul.f32 0.2, %v2005_v11  ;;  %3925 = vst [vmem:[%s4463_s17 + $0x118] sm:$0xff] %v3749_v20   ;;  %v2384_v26 = vsel %vm2128_vm14, %v2000_v9, %v2256_v21  ;;  %v2325_v27 = vmul.f32 0.2, %v2069_v16  ;;  %vm2131_vm2 = vcmp.gt.f32.partialorder %v2003_v17, 0.0 }
 0x110   : > { %v2259_v28 = vmul.f32 0.2, %v2003_v17  ;;  %v3584_v29 = vpack.c.bf16 %v2384_v26, %v2383_v2  ;;  %v2448_v30 = vsel %vm2192_vm15, %v2064_v10, %v2320_v24  ;;  %v2067_v32 = vadd.f32 %v4446_v8, %v1378_v13 }
 0x111   : > { %v2389_v31 = vsel %vm2133_vm0, %v2005_v11, %v2261_v25  ;;  %v3744_v33 = vpack.c.bf16 %v2448_v30, %v2447_v3  ;;  %v2453_v34 = vsel %vm2197_vm1, %v2069_v16, %v2325_v27  ;;  %v2006_v36 = vadd.f32 %v4053_v18, %v4446_v8 }
 0x112   : > { %v2387_v35 = vsel %vm2131_vm2, %v2003_v17, %v2259_v28  ;;  %3892 = vst [vmem:[%s4463_s17 + $0x10] sm:$0xff] %v3584_v29   ;;  %vm2195_vm3 = vcmp.gt.f32.partialorder %v2067_v32, 0.0  ;;  %v2323_v37 = vmul.f32 0.2, %v2067_v32  ;;  %v2070_v38 = vadd.f32 %v4117_v19, %v4446_v8  ;;  %v4056_v40 = vpop.f32.mrb[12].mxu0  ;;  %v4120_v41 = vpop.f32.mrb[12].mxu1 }
 0x113   : > { %v2004_v39 = vadd.f32 %v4446_v8, %v1125_v22  ;;  %3924 = vst [vmem:[%s4463_s17 + $0x110] sm:$0xff] %v3744_v33   ;;  %vm2134_vm4 = vcmp.gt.f32.partialorder %v2006_v36, 0.0  ;;  %v2262_v42 = vmul.f32 0.2, %v2006_v36  ;;  %v2068_v43 = vadd.f32 %v4446_v8, %v1381_v23  ;;  %v1138_v45 = vpop.f32.mrb[13].mxu0  ;;  %v1394_v46 = vpop.f32.mrb[13].mxu1 }
 0x114   : > { %v2009_v44 = vadd.f32 %v4056_v40, %v4446_v8  ;;  %v2451_v47 = vsel %vm2195_vm3, %v2067_v32, %v2323_v37  ;;  %vm2198_vm5 = vcmp.gt.f32.partialorder %v2070_v38, 0.0  ;;  %v2326_v48 = vmul.f32 0.2, %v2070_v38  ;;  %v4057_v49 = vpop.f32.mrb[14].mxu0  ;;  %v4121_v50 = vpop.f32.mrb[14].mxu1 }
 0x115   : > { %vm2132_vm6 = vcmp.gt.f32.partialorder %v2004_v39, 0.0  ;;  %v2390_v51 = vsel %vm2134_vm4, %v2006_v36, %v2262_v42  ;;  %v2260_v52 = vmul.f32 0.2, %v2004_v39  ;;  %vm2196_vm7 = vcmp.gt.f32.partialorder %v2068_v43, 0.0  ;;  %v1141_v54 = vpop.f32.mrb[15].mxu0  ;;  %v1397_v58 = vpop.f32.mrb[15].mxu1 }
 0x116   : > { %v2324_v53 = vmul.f32 0.2, %v2068_v43  ;;  %v3599_v55 = vpack.c.bf16 %v2390_v51, %v2389_v31  ;;  %v2454_v56 = vsel %vm2198_vm5, %v2070_v38, %v2326_v48  ;;  %vm2137_vm8 = vcmp.gt.f32.partialorder %v2009_v44, 0.0 }
 0x117   : > { %v2265_v57 = vmul.f32 0.2, %v2009_v44  ;;  %v3759_v59 = vpack.c.bf16 %v2454_v56, %v2453_v34  ;;  %v2388_v60 = vsel %vm2132_vm6, %v2004_v39, %v2260_v52  ;;  %v2073_v62 = vadd.f32 %v4120_v41, %v4446_v8 }
 0x118   : > { %v2452_v61 = vsel %vm2196_vm7, %v2068_v43, %v2324_v53  ;;  %3895 = vst [vmem:[%s4463_s17 + $0x28] sm:$0xff] %v3599_v55   ;;  %v3594_v63 = vpack.c.bf16 %v2388_v60, %v2387_v35  ;;  %v2007_v2 = vadd.f32 %v4446_v8, %v1138_v45  ;;  %v2071_v4 = vadd.f32 %v4446_v8, %v1394_v46 }
 0x119   : > { %v3754_v0 = vpack.c.bf16 %v2452_v61, %v2451_v47  ;;  %v2393_v1 = vsel %vm2137_vm8, %v2009_v44, %v2265_v57  ;;  %3927 = vst [vmem:[%s4463_s17 + $0x128] sm:$0xff] %v3759_v59   ;;  %vm2201_vm9 = vcmp.gt.f32.partialorder %v2073_v62, 0.0  ;;  %v2329_v3 = vmul.f32 0.2, %v2073_v62 }
 0x11a   : > { %v2010_v5 = vadd.f32 %v4057_v49, %v4446_v8  ;;  %3894 = vst [vmem:[%s4463_s17 + $0x20] sm:$0xff] %v3594_v63   ;;  %vm2135_vm10 = vcmp.gt.f32.partialorder %v2007_v2, 0.0  ;;  %v2263_v6 = vmul.f32 0.2, %v2007_v2  ;;  %v2074_v7 = vadd.f32 %v4121_v50, %v4446_v8  ;;  %v4060_v10 = vpop.f32.mrb[16].mxu0  ;;  %v4124_v11 = vpop.f32.mrb[16].mxu1 }
 0x11b   : > { %3926 = vst [vmem:[%s4463_s17 + $0x120] sm:$0xff] %v3754_v0   ;;  %v2008_v9 = vadd.f32 %v4446_v8, %v1141_v54  ;;  %v2457_v12 = vsel %vm2201_vm9, %v2073_v62, %v2329_v3  ;;  %vm2199_vm11 = vcmp.gt.f32.partialorder %v2071_v4, 0.0  ;;  %v2327_v13 = vmul.f32 0.2, %v2071_v4  ;;  %v1154_v14 = vpop.f32.mrb[17].mxu0  ;;  %v1410_v15 = vpop.f32.mrb[17].mxu1 }
 0x11c   : > { %vm2138_vm12 = vcmp.gt.f32.partialorder %v2010_v5, 0.0  ;;  %v2391_v16 = vsel %vm2135_vm10, %v2007_v2, %v2263_v6  ;;  %v2266_v17 = vmul.f32 0.2, %v2010_v5  ;;  %vm2202_vm13 = vcmp.gt.f32.partialorder %v2074_v7, 0.0  ;;  %v4061_v19 = vpop.f32.mrb[18].mxu0  ;;  %v4125_v23 = vpop.f32.mrb[18].mxu1 }
 0x11d   : > { %v2330_v18 = vmul.f32 0.2, %v2074_v7  ;;  %v2455_v20 = vsel %vm2199_vm11, %v2071_v4, %v2327_v13  ;;  %vm2136_vm14 = vcmp.gt.f32.partialorder %v2008_v9, 0.0  ;;  %v2264_v21 = vmul.f32 0.2, %v2008_v9  ;;  %v1157_v24 = vpop.f32.mrb[19].mxu0 }
 0x11e   : > { %v2072_v22 = vadd.f32 %v4446_v8, %v1397_v58  ;;  %v2394_v25 = vsel %vm2138_vm12, %v2010_v5, %v2266_v17  ;;  %v2013_v27 = vadd.f32 %v4060_v10, %v4446_v8  ;;  %v2077_v28 = vadd.f32 %v4124_v11, %v4446_v8  ;;  %v1413_v29 = vpop.f32.mrb[19].mxu1 }
 0x11f   : > { %v2458_v26 = vsel %vm2202_vm13, %v2074_v7, %v2330_v18  ;;  %v3609_v30 = vpack.c.bf16 %v2394_v25, %v2393_v1  ;;  %v2392_v32 = vsel %vm2136_vm14, %v2008_v9, %v2264_v21  ;;  %v2011_v37 = vadd.f32 %v4446_v8, %v1154_v14 }
 0x120   : > { %v3769_v31 = vpack.c.bf16 %v2458_v26, %v2457_v12  ;;  %vm2200_vm15 = vcmp.gt.f32.partialorder %v2072_v22, 0.0  ;;  %v3604_v33 = vpack.c.bf16 %v2392_v32, %v2391_v16  ;;  %v2328_v34 = vmul.f32 0.2, %v2072_v22 }
 0x121   : > { %vm2141_vm0 = vcmp.gt.f32.partialorder %v2013_v27, 0.0  ;;  %v2269_v35 = vmul.f32 0.2, %v2013_v27  ;;  %3897 = vst [vmem:[%s4463_s17 + $0x38] sm:$0xff] %v3609_v30   ;;  %vm2205_vm1 = vcmp.gt.f32.partialorder %v2077_v28, 0.0  ;;  %v2075_v38 = vadd.f32 %v4446_v8, %v1410_v15 }
 0x122   : > { %3929 = vst [vmem:[%s4463_s17 + $0x138] sm:$0xff] %v3769_v31   ;;  %v2333_v36 = vmul.f32 0.2, %v2077_v28  ;;  %3896 = vst [vmem:[%s4463_s17 + $0x30] sm:$0xff] %v3604_v33   ;;  %v2456_v39 = vsel %vm2200_vm15, %v2072_v22, %v2328_v34  ;;  %v2014_v41 = vadd.f32 %v4061_v19, %v4446_v8  ;;  %v2078_v42 = vadd.f32 %v4125_v23, %v4446_v8  ;;  %v4064_v43 = vpop.f32.mrb[20].mxu0  ;;  %v4128_v44 = vpop.f32.mrb[20].mxu1 }
 0x123   : > { %v2397_v40 = vsel %vm2141_vm0, %v2013_v27, %v2269_v35  ;;  %v3764_v45 = vpack.c.bf16 %v2456_v39, %v2455_v20  ;;  %vm2139_vm2 = vcmp.gt.f32.partialorder %v2011_v37, 0.0  ;;  %v2267_v47 = vmul.f32 0.2, %v2011_v37  ;;  %v1170_v48 = vpop.f32.mrb[21].mxu0  ;;  %v1426_v49 = vpop.f32.mrb[21].mxu1 }
 0x124   : > { %v2461_v46 = vsel %vm2205_vm1, %v2077_v28, %v2333_v36  ;;  %vm2203_vm3 = vcmp.gt.f32.partialorder %v2075_v38, 0.0  ;;  %v2331_v50 = vmul.f32 0.2, %v2075_v38  ;;  %vm2142_vm4 = vcmp.gt.f32.partialorder %v2014_v41, 0.0  ;;  %v4065_v55 = vpop.f32.mrb[22].mxu0  ;;  %v4129_v56 = vpop.f32.mrb[22].mxu1 }
 0x125   : > { %v2270_v51 = vmul.f32 0.2, %v2014_v41  ;;  %3928 = vst [vmem:[%s4463_s17 + $0x130] sm:$0xff] %v3764_v45   ;;  %v2395_v52 = vsel %vm2139_vm2, %v2011_v37, %v2267_v47  ;;  %vm2206_vm5 = vcmp.gt.f32.partialorder %v2078_v42, 0.0  ;;  %v2334_v53 = vmul.f32 0.2, %v2078_v42 }
 0x126   : > { %v2012_v54 = vadd.f32 %v4446_v8, %v1157_v24  ;;  %v2459_v57 = vsel %vm2203_vm3, %v2075_v38, %v2331_v50  ;;  %v2076_v59 = vadd.f32 %v4446_v8, %v1413_v29  ;;  %v2017_v60 = vadd.f32 %v4064_v43, %v4446_v8  ;;  %v1173_v61 = vpop.f32.mrb[23].mxu0  ;;  %v1429_v62 = vpop.f32.mrb[23].mxu1 }
 0x127   : > { %v2398_v58 = vsel %vm2142_vm4, %v2014_v41, %v2270_v51  ;;  %v2462_v0 = vsel %vm2206_vm5, %v2078_v42, %v2334_v53  ;;  %v2081_v6 = vadd.f32 %v4128_v44, %v4446_v8  ;;  %v2015_v7 = vadd.f32 %v4446_v8, %v1170_v48 }
 0x128   : > { %v3619_v63 = vpack.c.bf16 %v2398_v58, %v2397_v40  ;;  %vm2140_vm6 = vcmp.gt.f32.partialorder %v2012_v54, 0.0  ;;  %v2268_v1 = vmul.f32 0.2, %v2012_v54  ;;  %v3779_v2 = vpack.c.bf16 %v2462_v0, %v2461_v46 }
 0x129   : > { %vm2204_vm7 = vcmp.gt.f32.partialorder %v2076_v59, 0.0  ;;  %v2332_v3 = vmul.f32 0.2, %v2076_v59  ;;  %vm2145_vm8 = vcmp.gt.f32.partialorder %v2017_v60, 0.0  ;;  %v2273_v5 = vmul.f32 0.2, %v2017_v60 }
 0x12a   : > { %3899 = vst [vmem:[%s4463_s17 + $0x48] sm:$0xff] %v3619_v63   ;;  %v2396_v4 = vsel %vm2140_vm6, %v2012_v54, %v2268_v1  ;;  %3931 = vst [vmem:[%s4463_s17 + $0x148] sm:$0xff] %v3779_v2   ;;  %v2079_v11 = vadd.f32 %v4446_v8, %v1426_v49  ;;  %v2018_v12 = vadd.f32 %v4065_v55, %v4446_v8  ;;  %v4068_v13 = vpop.f32.mrb[24].mxu0  ;;  %v4132_v14 = vpop.f32.mrb[24].mxu1  ;;  %vm2209_vm9 = vcmp.gt.f32.partialorder %v2081_v6, 0.0 }
 0x12b   : > { %v3614_v9 = vpack.c.bf16 %v2396_v4, %v2395_v52  ;;  %v2460_v10 = vsel %vm2204_vm7, %v2076_v59, %v2332_v3  ;;  %v2401_v16 = vsel %vm2145_vm8, %v2017_v60, %v2273_v5  ;;  %v2337_v17 = vmul.f32 0.2, %v2081_v6  ;;  %v1186_v18 = vpop.f32.mrb[25].mxu0  ;;  %v1442_v19 = vpop.f32.mrb[25].mxu1 }
 0x12c   : > { %v3774_v15 = vpack.c.bf16 %v2460_v10, %v2459_v57  ;;  %vm2143_vm10 = vcmp.gt.f32.partialorder %v2015_v7, 0.0  ;;  %v2271_v20 = vmul.f32 0.2, %v2015_v7  ;;  %vm2207_vm11 = vcmp.gt.f32.partialorder %v2079_v11, 0.0  ;;  %v4069_v25 = vpop.f32.mrb[26].mxu0  ;;  %v4133_v26 = vpop.f32.mrb[26].mxu1 }
 0x12d   : > { %3898 = vst [vmem:[%s4463_s17 + $0x40] sm:$0xff] %v3614_v9   ;;  %v2335_v21 = vmul.f32 0.2, %v2079_v11  ;;  %v2465_v22 = vsel %vm2209_vm9, %v2081_v6, %v2337_v17  ;;  %vm2146_vm12 = vcmp.gt.f32.partialorder %v2018_v12, 0.0  ;;  %v2274_v23 = vmul.f32 0.2, %v2018_v12 }
 0x12e   : > { %3930 = vst [vmem:[%s4463_s17 + $0x140] sm:$0xff] %v3774_v15   ;;  %v2082_v24 = vadd.f32 %v4129_v56, %v4446_v8  ;;  %v2399_v27 = vsel %vm2143_vm10, %v2015_v7, %v2271_v20  ;;  %v2016_v29 = vadd.f32 %v4446_v8, %v1173_v61  ;;  %v2080_v30 = vadd.f32 %v4446_v8, %v1429_v62  ;;  %v1189_v31 = vpop.f32.mrb[27].mxu0  ;;  %v1445_v32 = vpop.f32.mrb[27].mxu1 }
 0x12f   : > { %v2463_v28 = vsel %vm2207_vm11, %v2079_v11, %v2335_v21  ;;  %v2402_v33 = vsel %vm2146_vm12, %v2018_v12, %v2274_v23  ;;  %v2021_v35 = vadd.f32 %v4068_v13, %v4446_v8  ;;  %v2085_v43 = vadd.f32 %v4132_v14, %v4446_v8 }
 0x130   : > { %vm2210_vm13 = vcmp.gt.f32.partialorder %v2082_v24, 0.0  ;;  %v2338_v34 = vmul.f32 0.2, %v2082_v24  ;;  %v3629_v36 = vpack.c.bf16 %v2402_v33, %v2401_v16  ;;  %vm2144_vm14 = vcmp.gt.f32.partialorder %v2016_v29, 0.0 }
 0x131   : > { %v2272_v37 = vmul.f32 0.2, %v2016_v29  ;;  %vm2208_vm15 = vcmp.gt.f32.partialorder %v2080_v30, 0.0  ;;  %v2336_v39 = vmul.f32 0.2, %v2080_v30  ;;  %vm2149_vm0 = vcmp.gt.f32.partialorder %v2021_v35, 0.0 }
 0x132   : > { %v2466_v38 = vsel %vm2210_vm13, %v2082_v24, %v2338_v34  ;;  %v2277_v40 = vmul.f32 0.2, %v2021_v35  ;;  %3901 = vst [vmem:[%s4463_s17 + $0x58] sm:$0xff] %v3629_v36   ;;  %v2019_v44 = vadd.f32 %v4446_v8, %v1186_v18  ;;  %v4072_v45 = vpop.f32.mrb[28].mxu0  ;;  %v4136_v46 = vpop.f32.mrb[28].mxu1  ;;  %v2083_v50 = vadd.f32 %v4446_v8, %v1442_v19 }
 0x133   : > { %v3789_v41 = vpack.c.bf16 %v2466_v38, %v2465_v22  ;;  %v2400_v42 = vsel %vm2144_vm14, %v2016_v29, %v2272_v37  ;;  %v2464_v48 = vsel %vm2208_vm15, %v2080_v30, %v2336_v39  ;;  %v1202_v51 = vpop.f32.mrb[29].mxu0  ;;  %v1458_v52 = vpop.f32.mrb[29].mxu1  ;;  %vm2213_vm1 = vcmp.gt.f32.partialorder %v2085_v43, 0.0 }
 0x134   : > { %v3624_v47 = vpack.c.bf16 %v2400_v42, %v2399_v27  ;;  %v2405_v49 = vsel %vm2149_vm0, %v2021_v35, %v2277_v40  ;;  %v3784_v53 = vpack.c.bf16 %v2464_v48, %v2463_v28  ;;  %v2341_v54 = vmul.f32 0.2, %v2085_v43  ;;  %v4073_v55 = vpop.f32.mrb[30].mxu0  ;;  %v4137_v56 = vpop.f32.mrb[30].mxu1 }
 0x135   : > { %3933 = vst [vmem:[%s4463_s17 + $0x158] sm:$0xff] %v3789_v41   ;;  %vm2147_vm2 = vcmp.gt.f32.partialorder %v2019_v44, 0.0  ;;  %v2275_v57 = vmul.f32 0.2, %v2019_v44  ;;  %vm2211_vm3 = vcmp.gt.f32.partialorder %v2083_v50, 0.0  ;;  %v2022_v59 = vadd.f32 %v4069_v25, %v4446_v8  ;;  %v1205_v60 = vpop.f32.mrb[31].mxu0 }
 0x136   : > { %3900 = vst [vmem:[%s4463_s17 + $0x50] sm:$0xff] %v3624_v47   ;;  %v2339_v58 = vmul.f32 0.2, %v2083_v50  ;;  %3932 = vst [vmem:[%s4463_s17 + $0x150] sm:$0xff] %v3784_v53   ;;  %v2469_v61 = vsel %vm2213_vm1, %v2085_v43, %v2341_v54  ;;  %v2086_v62 = vadd.f32 %v4133_v26, %v4446_v8  ;;  %v2020_v63 = vadd.f32 %v4446_v8, %v1189_v31  ;;  %v1461_v1 = vpop.f32.mrb[31].mxu1 }
 0x137   : > { %v2084_v0 = vadd.f32 %v4446_v8, %v1445_v32  ;;  %v2403_v2 = vsel %vm2147_vm2, %v2019_v44, %v2275_v57  ;;  %vm2150_vm4 = vcmp.gt.f32.partialorder %v2022_v59, 0.0  ;;  %v2278_v4 = vmul.f32 0.2, %v2022_v59 }
 0x138   : > { %v2467_v3 = vsel %vm2211_vm3, %v2083_v50, %v2339_v58  ;;  %vm2214_vm5 = vcmp.gt.f32.partialorder %v2086_v62, 0.0  ;;  %v2342_v5 = vmul.f32 0.2, %v2086_v62  ;;  %vm2148_vm6 = vcmp.gt.f32.partialorder %v2020_v63, 0.0 }
 0x139   : > { %v2276_v6 = vmul.f32 0.2, %v2020_v63  ;;  %v2406_v7 = vsel %vm2150_vm4, %v2022_v59, %v2278_v4  ;;  %vm2212_vm7 = vcmp.gt.f32.partialorder %v2084_v0, 0.0  ;;  %v2340_v9 = vmul.f32 0.2, %v2084_v0 }
 0x13a   : > { %v2025_v10 = vadd.f32 %v4072_v45, %v4446_v8  ;;  %v3639_v11 = vpack.c.bf16 %v2406_v7, %v2405_v49  ;;  %v2470_v12 = vsel %vm2214_vm5, %v2086_v62, %v2342_v5  ;;  %v2089_v14 = vadd.f32 %v4136_v46, %v4446_v8  ;;  %v4076_v15 = vpop.f32.mrb[32].mxu0  ;;  %v4140_v16 = vpop.f32.mrb[32].mxu1 }
 0x13b   : > { %v2404_v13 = vsel %vm2148_vm6, %v2020_v63, %v2276_v6  ;;  %v3799_v17 = vpack.c.bf16 %v2470_v12, %v2469_v61  ;;  %v2468_v19 = vsel %vm2212_vm7, %v2084_v0, %v2340_v9  ;;  %v1218_v20 = vpop.f32.mrb[33].mxu0  ;;  %v1474_v21 = vpop.f32.mrb[33].mxu1  ;;  %v2023_v26 = vadd.f32 %v4446_v8, %v1202_v51 }
 0x13c   : > { %v3634_v18 = vpack.c.bf16 %v2404_v13, %v2403_v2  ;;  %vm2153_vm8 = vcmp.gt.f32.partialorder %v2025_v10, 0.0  ;;  %3903 = vst [vmem:[%s4463_s17 + $0x68] sm:$0xff] %v3639_v11   ;;  %v3794_v22 = vpack.c.bf16 %v2468_v19, %v2467_v3  ;;  %v2281_v23 = vmul.f32 0.2, %v2025_v10  ;;  %v4077_v25 = vpop.f32.mrb[34].mxu0  ;;  %v4141_v30 = vpop.f32.mrb[34].mxu1 }
 0x13d   : > { %vm2217_vm9 = vcmp.gt.f32.partialorder %v2089_v14, 0.0  ;;  %v2345_v24 = vmul.f32 0.2, %v2089_v14  ;;  %3935 = vst [vmem:[%s4463_s17 + $0x168] sm:$0xff] %v3799_v17   ;;  %v2087_v27 = vadd.f32 %v4446_v8, %v1458_v52  ;;  %v2026_v28 = vadd.f32 %v4073_v55, %v4446_v8  ;;  %v1221_v31 = vpop.f32.mrb[35].mxu0  ;;  %v1477_v36 = vpop.f32.mrb[35].mxu1 }
 0x13e   : > { %3902 = vst [vmem:[%s4463_s17 + $0x60] sm:$0xff] %v3634_v18   ;;  %v2090_v29 = vadd.f32 %v4137_v56, %v4446_v8  ;;  %3934 = vst [vmem:[%s4463_s17 + $0x160] sm:$0xff] %v3794_v22   ;;  %v2409_v32 = vsel %vm2153_vm8, %v2025_v10, %v2281_v23  ;;  %v2024_v34 = vadd.f32 %v4446_v8, %v1205_v60  ;;  %vm2151_vm10 = vcmp.gt.f32.partialorder %v2023_v26, 0.0 }
 0x13f   : > { %v2473_v33 = vsel %vm2217_vm9, %v2089_v14, %v2345_v24  ;;  %v2088_v35 = vadd.f32 %v4446_v8, %v1461_v1  ;;  %v2279_v37 = vmul.f32 0.2, %v2023_v26  ;;  %vm2215_vm11 = vcmp.gt.f32.partialorder %v2087_v27, 0.0 }
 0x140   : > { %v2343_v38 = vmul.f32 0.2, %v2087_v27  ;;  %vm2154_vm12 = vcmp.gt.f32.partialorder %v2026_v28, 0.0  ;;  %v2282_v39 = vmul.f32 0.2, %v2026_v28  ;;  %vm2218_vm13 = vcmp.gt.f32.partialorder %v2090_v29, 0.0 }
 0x141   : > { %v2346_v40 = vmul.f32 0.2, %v2090_v29  ;;  %v2407_v41 = vsel %vm2151_vm10, %v2023_v26, %v2279_v37  ;;  %vm2152_vm14 = vcmp.gt.f32.partialorder %v2024_v34, 0.0  ;;  %v2280_v43 = vmul.f32 0.2, %v2024_v34 }
 0x142   : > { %v2471_v42 = vsel %vm2215_vm11, %v2087_v27, %v2343_v38  ;;  %v2410_v44 = vsel %vm2154_vm12, %v2026_v28, %v2282_v39  ;;  %vm2216_vm15 = vcmp.gt.f32.partialorder %v2088_v35, 0.0  ;;  %v2344_v46 = vmul.f32 0.2, %v2088_v35  ;;  %v4080_v47 = vpop.f32.mrb[36].mxu0  ;;  %v4144_v48 = vpop.f32.mrb[36].mxu1 }
 0x143   : > { %v2474_v45 = vsel %vm2218_vm13, %v2090_v29, %v2346_v40  ;;  %v3649_v49 = vpack.c.bf16 %v2410_v44, %v2409_v32  ;;  %v2408_v51 = vsel %vm2152_vm14, %v2024_v34, %v2280_v43  ;;  %v2029_v52 = vadd.f32 %v4076_v15, %v4446_v8  ;;  %v4551_v53 = vpop.f32.mrb[37].mxu0  ;;  %v4553_v54 = vpop.f32.mrb[37].mxu1 }
 0x144   : > { %v3809_v50 = vpack.c.bf16 %v2474_v45, %v2473_v33  ;;  %v3644_v55 = vpack.c.bf16 %v2408_v51, %v2407_v41  ;;  %v2472_v56 = vsel %vm2216_vm15, %v2088_v35, %v2344_v46  ;;  %v2093_v57 = vadd.f32 %v4140_v16, %v4446_v8  ;;  %v4081_v59 = vpop.f32.mrb[38].mxu0  ;;  %v4145_v60 = vpop.f32.mrb[38].mxu1 }
 0x145   : > { %v2027_v58 = vadd.f32 %v4446_v8, %v1218_v20  ;;  %3905 = vst [vmem:[%s4463_s17 + $0x78] sm:$0xff] %v3649_v49   ;;  %v3804_v61 = vpack.c.bf16 %v2472_v56, %v2471_v42  ;;  %vm2157_vm0 = vcmp.gt.f32.partialorder %v2029_v52, 0.0  ;;  %v2285_v62 = vmul.f32 0.2, %v2029_v52  ;;  %v1237_v0 = vpop.f32.mrb[39].mxu0  ;;  %v1493_v1 = vpop.f32.mrb[39].mxu1 }
 0x146   : > { %3937 = vst [vmem:[%s4463_s17 + $0x178] sm:$0xff] %v3809_v50   ;;  %v2091_v63 = vadd.f32 %v4446_v8, %v1474_v21  ;;  %3904 = vst [vmem:[%s4463_s17 + $0x70] sm:$0xff] %v3644_v55   ;;  %vm2221_vm1 = vcmp.gt.f32.partialorder %v2093_v57, 0.0  ;;  %v2349_v2 = vmul.f32 0.2, %v2093_v57  ;;  %v2030_v6 = vadd.f32 %v4077_v25, %v4446_v8 }
 0x147   : > { %vm2155_vm2 = vcmp.gt.f32.partialorder %v2027_v58, 0.0  ;;  %v2283_v3 = vmul.f32 0.2, %v2027_v58  ;;  %3936 = vst [vmem:[%s4463_s17 + $0x170] sm:$0xff] %v3804_v61   ;;  %v2413_v4 = vsel %vm2157_vm0, %v2029_v52, %v2285_v62  ;;  %v2094_v10 = vadd.f32 %v4141_v30, %v4446_v8 }
 0x148   : > { %vm2219_vm3 = vcmp.gt.f32.partialorder %v2091_v63, 0.0  ;;  %v2347_v5 = vmul.f32 0.2, %v2091_v63  ;;  %v2477_v7 = vsel %vm2221_vm1, %v2093_v57, %v2349_v2  ;;  %v2028_v11 = vadd.f32 %v4446_v8, %v1221_v31 }
 0x149   : > { %v2411_v9 = vsel %vm2155_vm2, %v2027_v58, %v2283_v3  ;;  %vm2158_vm4 = vcmp.gt.f32.partialorder %v2030_v6, 0.0  ;;  %v2286_v13 = vmul.f32 0.2, %v2030_v6  ;;  %v2092_v14 = vadd.f32 %v4446_v8, %v1477_v36 }
 0x14a   : > { %v2475_v12 = vsel %vm2219_vm3, %v2091_v63, %v2347_v5  ;;  %vm2222_vm5 = vcmp.gt.f32.partialorder %v2094_v10, 0.0  ;;  %v2350_v15 = vmul.f32 0.2, %v2094_v10  ;;  %vm2156_vm6 = vcmp.gt.f32.partialorder %v2028_v11, 0.0  ;;  %v4084_v20 = vpop.f32.mrb[40].mxu0  ;;  %v4148_v21 = vpop.f32.mrb[40].mxu1 }
 0x14b   : > { %v2284_v16 = vmul.f32 0.2, %v2028_v11  ;;  %v2414_v17 = vsel %vm2158_vm4, %v2030_v6, %v2286_v13  ;;  %vm2220_vm7 = vcmp.gt.f32.partialorder %v2092_v14, 0.0  ;;  %v2348_v18 = vmul.f32 0.2, %v2092_v14  ;;  %v1250_v26 = vpop.f32.mrb[41].mxu0 }
 0x14c   : > { %v2033_v19 = vadd.f32 %v4080_v47, %v4446_v8  ;;  %v3659_v22 = vpack.c.bf16 %v2414_v17, %v2413_v4  ;;  %v2478_v23 = vsel %vm2222_vm5, %v2094_v10, %v2350_v15  ;;  %v2097_v25 = vadd.f32 %v4144_v48, %v4446_v8  ;;  %v1506_v27 = vpop.f32.mrb[41].mxu1  ;;  %v4568_v31 = vpop.f32.mrb[42].mxu0 }
 0x14d   : > { %v2412_v24 = vsel %vm2156_vm6, %v2028_v11, %v2284_v16  ;;  %v3819_v28 = vpack.c.bf16 %v2478_v23, %v2477_v7  ;;  %v2476_v30 = vsel %vm2220_vm7, %v2092_v14, %v2348_v18  ;;  %v4570_v32 = vpop.f32.mrb[42].mxu1  ;;  %v4573_v36 = vpop.f32.mrb[43].mxu0  ;;  %v2031_v37 = vadd.f32 %v4446_v8, %v4551_v53 }
 0x14e   : > { %v3654_v29 = vpack.c.bf16 %v2412_v24, %v2411_v9  ;;  %vm2161_vm8 = vcmp.gt.f32.partialorder %v2033_v19, 0.0  ;;  %3907 = vst [vmem:[%s4463_s17 + $0x88] sm:$0xff] %v3659_v22   ;;  %v3814_v33 = vpack.c.bf16 %v2476_v30, %v2475_v12  ;;  %v2289_v34 = vmul.f32 0.2, %v2033_v19  ;;  %v4583_v41 = vpop.f32.mrb[43].mxu1 }
 0x14f   : > { %vm2225_vm9 = vcmp.gt.f32.partialorder %v2097_v25, 0.0  ;;  %v2353_v35 = vmul.f32 0.2, %v2097_v25  ;;  %3939 = vst [vmem:[%s4463_s17 + $0x188] sm:$0xff] %v3819_v28   ;;  %v2095_v38 = vadd.f32 %v4446_v8, %v4553_v54  ;;  %v2034_v39 = vadd.f32 %v4081_v59, %v4446_v8 }
 0x150   : > { %3906 = vst [vmem:[%s4463_s17 + $0x80] sm:$0xff] %v3654_v29   ;;  %v2098_v40 = vadd.f32 %v4145_v60, %v4446_v8  ;;  %3938 = vst [vmem:[%s4463_s17 + $0x180] sm:$0xff] %v3814_v33   ;;  %v2417_v42 = vsel %vm2161_vm8, %v2033_v19, %v2289_v34  ;;  %v2032_v44 = vadd.f32 %v4446_v8, %v1237_v0  ;;  %vm2159_vm10 = vcmp.gt.f32.partialorder %v2031_v37, 0.0  ;;  %v4614_v19 = vld [vmem:[%s4798_s2] ss:$0 sm:$0xff] }
 0x151   : > { %v2481_v43 = vsel %vm2225_vm9, %v2097_v25, %v2353_v35  ;;  %v2096_v45 = vadd.f32 %v4446_v8, %v1493_v1  ;;  %v2287_v46 = vmul.f32 0.2, %v2031_v37  ;;  %vm2223_vm11 = vcmp.gt.f32.partialorder %v2095_v38, 0.0 }
 0x152   : > { %v2351_v47 = vmul.f32 0.2, %v2095_v38  ;;  %vm2162_vm12 = vcmp.gt.f32.partialorder %v2034_v39, 0.0  ;;  %v2290_v48 = vmul.f32 0.2, %v2034_v39  ;;  %vm2226_vm13 = vcmp.gt.f32.partialorder %v2098_v40, 0.0 }
 0x153   : > { %v2354_v49 = vmul.f32 0.2, %v2098_v40  ;;  %v2415_v50 = vsel %vm2159_vm10, %v2031_v37, %v2287_v46  ;;  %vm2160_vm14 = vcmp.gt.f32.partialorder %v2032_v44, 0.0  ;;  %v2288_v52 = vmul.f32 0.2, %v2032_v44  ;;  %v4088_v53 = vpop.f32.mrb[44].mxu0 }
 0x154   : > { %v2479_v51 = vsel %vm2223_vm11, %v2095_v38, %v2351_v47  ;;  %v4152_v54 = vpop.f32.mrb[44].mxu1  ;;  %v2418_v55 = vsel %vm2162_vm12, %v2034_v39, %v2290_v48  ;;  %vm2224_vm15 = vcmp.gt.f32.partialorder %v2096_v45, 0.0  ;;  %v2352_v57 = vmul.f32 0.2, %v2096_v45  ;;  %v4589_v58 = vpop.f32.mrb[45].mxu0 }
 0x155   : > { %v2482_v56 = vsel %vm2226_vm13, %v2098_v40, %v2354_v49  ;;  %v4591_v59 = vpop.f32.mrb[45].mxu1  ;;  %v3669_v60 = vpack.c.bf16 %v2418_v55, %v2417_v42  ;;  %v2416_v62 = vsel %vm2160_vm14, %v2032_v44, %v2288_v52  ;;  %v2037_v63 = vadd.f32 %v4084_v20, %v4446_v8  ;;  %v4594_v0 = vpop.f32.mrb[46].mxu0 }
 0x156   : > { %v3829_v61 = vpack.c.bf16 %v2482_v56, %v2481_v43  ;;  %v4596_v1 = vpop.f32.mrb[46].mxu1  ;;  %v3664_v2 = vpack.c.bf16 %v2416_v62, %v2415_v50  ;;  %v2480_v3 = vsel %vm2224_vm15, %v2096_v45, %v2352_v57  ;;  %v2101_v4 = vadd.f32 %v4148_v21, %v4446_v8  ;;  %v4600_v6 = vpop.f32.mrb[47].mxu0 }
 0x157   : > { %v2035_v5 = vadd.f32 %v4446_v8, %v1250_v26  ;;  %v4602_v7 = vpop.f32.mrb[47].mxu1  ;;  %3909 = vst [vmem:[%s4463_s17 + $0x98] sm:$0xff] %v3669_v60   ;;  %v3824_v9 = vpack.c.bf16 %v2480_v3, %v2479_v51  ;;  %vm2165_vm0 = vcmp.gt.f32.partialorder %v2037_v63, 0.0  ;;  %v2293_v10 = vmul.f32 0.2, %v2037_v63 }
 0x158   : > { %3941 = vst [vmem:[%s4463_s17 + $0x198] sm:$0xff] %v3829_v61   ;;  %v2099_v11 = vadd.f32 %v4446_v8, %v1506_v27  ;;  %3908 = vst [vmem:[%s4463_s17 + $0x90] sm:$0xff] %v3664_v2   ;;  %vm2229_vm1 = vcmp.gt.f32.partialorder %v2101_v4, 0.0  ;;  %v2357_v12 = vmul.f32 0.2, %v2101_v4  ;;  %v2038_v16 = vadd.f32 %v4568_v31, %v4446_v8 }
 0x159   : > { %vm2163_vm2 = vcmp.gt.f32.partialorder %v2035_v5, 0.0  ;;  %v2291_v13 = vmul.f32 0.2, %v2035_v5  ;;  %3940 = vst [vmem:[%s4463_s17 + $0x190] sm:$0xff] %v3824_v9   ;;  %v2421_v14 = vsel %vm2165_vm0, %v2037_v63, %v2293_v10  ;;  %v2102_v20 = vadd.f32 %v4614_v19, %v4570_v32 }
 0x15a   : > { %vm2227_vm3 = vcmp.gt.f32.partialorder %v2099_v11, 0.0  ;;  %v2355_v15 = vmul.f32 0.2, %v2099_v11  ;;  %v2485_v17 = vsel %vm2229_vm1, %v2101_v4, %v2357_v12  ;;  %v2036_v21 = vadd.f32 %v4614_v19, %v4573_v36  ;;  %v4620_v22 = vpop.f32.mrb[48].mxu0  ;;  %v4622_v23 = vpop.f32.mrb[48].mxu1 }
 0x15b   : > { %v2419_v18 = vsel %vm2163_vm2, %v2035_v5, %v2291_v13  ;;  %vm2166_vm4 = vcmp.gt.f32.partialorder %v2038_v16, 0.0  ;;  %v2294_v8 = vmul.f32 0.2, %v2038_v16  ;;  %v2100_v25 = vadd.f32 %v4614_v19, %v4583_v41  ;;  %v4626_v26 = vpop.f32.mrb[49].mxu0  ;;  %v4628_v27 = vpop.f32.mrb[49].mxu1 }
 0x15c   : > { %v2483_v24 = vsel %vm2227_vm3, %v2099_v11, %v2355_v15  ;;  %vm2230_vm5 = vcmp.gt.f32.partialorder %v2102_v20, 0.0  ;;  %v2358_v28 = vmul.f32 0.2, %v2102_v20  ;;  %vm2164_vm6 = vcmp.gt.f32.partialorder %v2036_v21, 0.0  ;;  %v4631_v33 = vpop.f32.mrb[50].mxu0  ;;  %v4633_v34 = vpop.f32.mrb[50].mxu1 }
 0x15d   : > { %v2292_v29 = vmul.f32 0.2, %v2036_v21  ;;  %v2422_v30 = vsel %vm2166_vm4, %v2038_v16, %v2294_v8  ;;  %vm2228_vm7 = vcmp.gt.f32.partialorder %v2100_v25, 0.0  ;;  %v2356_v31 = vmul.f32 0.2, %v2100_v25  ;;  %v4636_v39 = vpop.f32.mrb[51].mxu0 }
 0x15e   : > { %v2041_v32 = vadd.f32 %v4614_v19, %v4088_v53  ;;  %v3679_v35 = vpack.c.bf16 %v2422_v30, %v2421_v14  ;;  %v2486_v36 = vsel %vm2230_vm5, %v2102_v20, %v2358_v28  ;;  %v2105_v38 = vadd.f32 %v4614_v19, %v4152_v54  ;;  %v4638_v40 = vpop.f32.mrb[51].mxu1 }
 0x15f   : > { %v2420_v37 = vsel %vm2164_vm6, %v2036_v21, %v2292_v29  ;;  %v3839_v41 = vpack.c.bf16 %v2486_v36, %v2485_v17  ;;  %v2484_v43 = vsel %vm2228_vm7, %v2100_v25, %v2356_v31  ;;  %v2039_v47 = vadd.f32 %v4614_v19, %v4589_v58 }
 0x160   : > { %v3674_v42 = vpack.c.bf16 %v2420_v37, %v2419_v18  ;;  %vm2169_vm8 = vcmp.gt.f32.partialorder %v2041_v32, 0.0  ;;  %3911 = vst [vmem:[%s4463_s17 + $0xa8] sm:$0xff] %v3679_v35   ;;  %v3834_v44 = vpack.c.bf16 %v2484_v43, %v2483_v24  ;;  %v2297_v45 = vmul.f32 0.2, %v2041_v32 }
 0x161   : > { %vm2233_vm9 = vcmp.gt.f32.partialorder %v2105_v38, 0.0  ;;  %v2361_v46 = vmul.f32 0.2, %v2105_v38  ;;  %3943 = vst [vmem:[%s4463_s17 + $0x1a8] sm:$0xff] %v3839_v41   ;;  %v2103_v48 = vadd.f32 %v4614_v19, %v4591_v59  ;;  %v2042_v49 = vadd.f32 %v4614_v19, %v4594_v0 }
 0x162   : > { %3910 = vst [vmem:[%s4463_s17 + $0xa0] sm:$0xff] %v3674_v42   ;;  %v2106_v50 = vadd.f32 %v4614_v19, %v4596_v1  ;;  %3942 = vst [vmem:[%s4463_s17 + $0x1a0] sm:$0xff] %v3834_v44   ;;  %v2425_v51 = vsel %vm2169_vm8, %v2041_v32, %v2297_v45  ;;  %v2040_v53 = vadd.f32 %v4614_v19, %v4600_v6  ;;  %v4656_v55 = vpop.f32.mrb[52].mxu0  ;;  %v4658_v56 = vpop.f32.mrb[52].mxu1  ;;  %vm2167_vm10 = vcmp.gt.f32.partialorder %v2039_v47, 0.0 }
 0x163   : > { %v2489_v52 = vsel %vm2233_vm9, %v2105_v38, %v2361_v46  ;;  %v2104_v54 = vadd.f32 %v4614_v19, %v4602_v7  ;;  %v2295_v57 = vmul.f32 0.2, %v2039_v47  ;;  %vm2231_vm11 = vcmp.gt.f32.partialorder %v2103_v48, 0.0  ;;  %v4660_v0 = vpop.f32.mrb[53].mxu0  ;;  %v4662_v1 = vpop.f32.mrb[53].mxu1 }
 0x164   : > { %v2359_v58 = vmul.f32 0.2, %v2103_v48  ;;  %vm2170_vm12 = vcmp.gt.f32.partialorder %v2042_v49, 0.0  ;;  %v2298_v59 = vmul.f32 0.2, %v2042_v49  ;;  %vm2234_vm13 = vcmp.gt.f32.partialorder %v2106_v50, 0.0 }
 0x165   : > { %v2362_v60 = vmul.f32 0.2, %v2106_v50  ;;  %v2423_v61 = vsel %vm2167_vm10, %v2039_v47, %v2295_v57  ;;  %vm2168_vm14 = vcmp.gt.f32.partialorder %v2040_v53, 0.0  ;;  %v2296_v63 = vmul.f32 0.2, %v2040_v53  ;;  %v4664_v5 = vpop.f32.mrb[54].mxu0 }
 0x166   : > { %v2487_v62 = vsel %vm2231_vm11, %v2103_v48, %v2359_v58  ;;  %v2426_v2 = vsel %vm2170_vm12, %v2042_v49, %v2298_v59  ;;  %vm2232_vm15 = vcmp.gt.f32.partialorder %v2104_v54, 0.0  ;;  %v2360_v4 = vmul.f32 0.2, %v2104_v54  ;;  %v4666_v6 = vpop.f32.mrb[54].mxu1  ;;  %v4670_v12 = vpop.f32.mrb[55].mxu0 }
 0x167   : > { %v2490_v3 = vsel %vm2234_vm13, %v2106_v50, %v2362_v60  ;;  %v3689_v7 = vpack.c.bf16 %v2426_v2, %v2425_v51  ;;  %v2424_v10 = vsel %vm2168_vm14, %v2040_v53, %v2296_v63  ;;  %v2045_v11 = vadd.f32 %v4614_v19, %v4620_v22  ;;  %v4672_v13 = vpop.f32.mrb[55].mxu1 }
 0x168   : > { %v3849_v9 = vpack.c.bf16 %v2490_v3, %v2489_v52  ;;  %v3684_v14 = vpack.c.bf16 %v2424_v10, %v2423_v61  ;;  %v2488_v15 = vsel %vm2232_vm15, %v2104_v54, %v2360_v4  ;;  %v2109_v16 = vadd.f32 %v4614_v19, %v4622_v23 }
 0x169   : > { %v2043_v17 = vadd.f32 %v4614_v19, %v4626_v26  ;;  %3913 = vst [vmem:[%s4463_s17 + $0xb8] sm:$0xff] %v3689_v7   ;;  %v3844_v18 = vpack.c.bf16 %v2488_v15, %v2487_v62  ;;  %vm2173_vm0 = vcmp.gt.f32.partialorder %v2045_v11, 0.0  ;;  %v2301_v20 = vmul.f32 0.2, %v2045_v11 }
 0x16a   : > { %3945 = vst [vmem:[%s4463_s17 + $0x1b8] sm:$0xff] %v3849_v9   ;;  %v2107_v21 = vadd.f32 %v4614_v19, %v4628_v27  ;;  %3912 = vst [vmem:[%s4463_s17 + $0xb0] sm:$0xff] %v3684_v14   ;;  %vm2237_vm1 = vcmp.gt.f32.partialorder %v2109_v16, 0.0  ;;  %v2365_v22 = vmul.f32 0.2, %v2109_v16  ;;  %v2046_v25 = vadd.f32 %v4614_v19, %v4631_v33  ;;  %v4686_v26 = vpop.f32.mrb[56].mxu0 }
 0x16b   : > { %vm2171_vm2 = vcmp.gt.f32.partialorder %v2043_v17, 0.0  ;;  %v2299_v24 = vmul.f32 0.2, %v2043_v17  ;;  %3944 = vst [vmem:[%s4463_s17 + $0x1b0] sm:$0xff] %v3844_v18   ;;  %v2429_v8 = vsel %vm2173_vm0, %v2045_v11, %v2301_v20  ;;  %v4688_v28 = vpop.f32.mrb[56].mxu1  ;;  %v2110_v27 = vadd.f32 %v4614_v19, %v4633_v34  ;;  %v4694_v32 = vpop.f32.mrb[57].mxu0 }
 0x16c   : > { %vm2235_vm3 = vcmp.gt.f32.partialorder %v2107_v21, 0.0  ;;  %v2363_v23 = vmul.f32 0.2, %v2107_v21  ;;  %v2493_v29 = vsel %vm2237_vm1, %v2109_v16, %v2365_v22  ;;  %v2044_v31 = vadd.f32 %v4614_v19, %v4636_v39  ;;  %v4696_v35 = vpop.f32.mrb[57].mxu1  ;;  %v4700_v38 = vpop.f32.mrb[58].mxu0 }
 0x16d   : > { %v2427_v30 = vsel %vm2171_vm2, %v2043_v17, %v2299_v24  ;;  %vm2174_vm4 = vcmp.gt.f32.partialorder %v2046_v25, 0.0  ;;  %v2302_v37 = vmul.f32 0.2, %v2046_v25  ;;  %v2108_v33 = vadd.f32 %v4614_v19, %v4638_v40  ;;  %v4702_v41 = vpop.f32.mrb[58].mxu1  ;;  %v4706_v45 = vpop.f32.mrb[59].mxu0 }
 0x16e   : > { %v2491_v36 = vsel %vm2235_vm3, %v2107_v21, %v2363_v23  ;;  %vm2238_vm5 = vcmp.gt.f32.partialorder %v2110_v27, 0.0  ;;  %v2366_v42 = vmul.f32 0.2, %v2110_v27  ;;  %vm2172_vm6 = vcmp.gt.f32.partialorder %v2044_v31, 0.0  ;;  %v4708_v46 = vpop.f32.mrb[59].mxu1 }
 0x16f   : > { %v2300_v34 = vmul.f32 0.2, %v2044_v31  ;;  %v2430_v39 = vsel %vm2174_vm4, %v2046_v25, %v2302_v37  ;;  %vm2236_vm7 = vcmp.gt.f32.partialorder %v2108_v33, 0.0  ;;  %v2364_v43 = vmul.f32 0.2, %v2108_v33 }
 0x170   : > { %v2049_v44 = vadd.f32 %v4614_v19, %v4656_v55  ;;  %v3699_v40 = vpack.c.bf16 %v2430_v39, %v2429_v8  ;;  %v2494_v47 = vsel %vm2238_vm5, %v2110_v27, %v2366_v42  ;;  %v2113_v49 = vadd.f32 %v4614_v19, %v4658_v56 }
 0x171   : > { %v2428_v48 = vsel %vm2172_vm6, %v2044_v31, %v2300_v34  ;;  %v3859_v50 = vpack.c.bf16 %v2494_v47, %v2493_v29  ;;  %v2492_v52 = vsel %vm2236_vm7, %v2108_v33, %v2364_v43  ;;  %v2047_v58 = vadd.f32 %v4614_v19, %v4660_v0 }
 0x172   : > { %v3694_v51 = vpack.c.bf16 %v2428_v48, %v2427_v30  ;;  %vm2177_vm8 = vcmp.gt.f32.partialorder %v2049_v44, 0.0  ;;  %3915 = vst [vmem:[%s4463_s17 + $0xc8] sm:$0xff] %v3699_v40   ;;  %v3854_v53 = vpack.c.bf16 %v2492_v52, %v2491_v36  ;;  %v2305_v54 = vmul.f32 0.2, %v2049_v44  ;;  %v4713_v57 = vpop.f32.mrb[60].mxu0  ;;  %v4725_v61 = vpop.f32.mrb[60].mxu1 }
 0x173   : > { %vm2241_vm9 = vcmp.gt.f32.partialorder %v2113_v49, 0.0  ;;  %v2369_v55 = vmul.f32 0.2, %v2113_v49  ;;  %3947 = vst [vmem:[%s4463_s17 + $0x1c8] sm:$0xff] %v3859_v50   ;;  %v2111_v56 = vadd.f32 %v4614_v19, %v4662_v1  ;;  %v2050_v59 = vadd.f32 %v4614_v19, %v4664_v5  ;;  %v4727_v62 = vpop.f32.mrb[61].mxu0  ;;  %v4735_v3 = vpop.f32.mrb[61].mxu1 }
 0x174   : > { %3914 = vst [vmem:[%s4463_s17 + $0xc0] sm:$0xff] %v3694_v51   ;;  %v2114_v60 = vadd.f32 %v4614_v19, %v4666_v6  ;;  %3946 = vst [vmem:[%s4463_s17 + $0x1c0] sm:$0xff] %v3854_v53   ;;  %v2433_v63 = vsel %vm2177_vm8, %v2049_v44, %v2305_v54  ;;  %v2048_v0 = vadd.f32 %v4614_v19, %v4670_v12  ;;  %v4737_v4 = vpop.f32.mrb[62].mxu0  ;;  %vm2175_vm10 = vcmp.gt.f32.partialorder %v2047_v58, 0.0  ;;  %v4739_v12 = vpop.f32.mrb[62].mxu1 }
 0x175   : > { %v2497_v2 = vsel %vm2241_vm9, %v2113_v49, %v2369_v55  ;;  %v2112_v1 = vadd.f32 %v4614_v19, %v4672_v13  ;;  %v2303_v5 = vmul.f32 0.2, %v2047_v58  ;;  %vm2239_vm11 = vcmp.gt.f32.partialorder %v2111_v56, 0.0  ;;  %v4741_v13 = vpop.f32.mrb[63].mxu0  ;;  %v1589_v18 = vpop.f32.mrb[63].mxu1 }
 0x176   : > { %v2367_v6 = vmul.f32 0.2, %v2111_v56  ;;  %vm2178_vm12 = vcmp.gt.f32.partialorder %v2050_v59, 0.0  ;;  %v2306_v7 = vmul.f32 0.2, %v2050_v59  ;;  %vm2242_vm13 = vcmp.gt.f32.partialorder %v2114_v60, 0.0 }
 0x177   : > { %v2370_v9 = vmul.f32 0.2, %v2114_v60  ;;  %v2431_v10 = vsel %vm2175_vm10, %v2047_v58, %v2303_v5  ;;  %vm2176_vm14 = vcmp.gt.f32.partialorder %v2048_v0, 0.0  ;;  %v2304_v14 = vmul.f32 0.2, %v2048_v0 }
 0x178   : > { %v2495_v11 = vsel %vm2239_vm11, %v2111_v56, %v2367_v6  ;;  %v2434_v15 = vsel %vm2178_vm12, %v2050_v59, %v2306_v7  ;;  %vm2240_vm15 = vcmp.gt.f32.partialorder %v2112_v1, 0.0  ;;  %v2368_v17 = vmul.f32 0.2, %v2112_v1 }
 0x179   : > { %v2498_v16 = vsel %vm2242_vm13, %v2114_v60, %v2370_v9  ;;  %v3709_v20 = vpack.c.bf16 %v2434_v15, %v2433_v63  ;;  %v2432_v22 = vsel %vm2176_vm14, %v2048_v0, %v2304_v14  ;;  %v2053_v24 = vadd.f32 %v4614_v19, %v4686_v26 }
 0x17a   : > { %v3869_v21 = vpack.c.bf16 %v2498_v16, %v2497_v2  ;;  %v3704_v8 = vpack.c.bf16 %v2432_v22, %v2431_v10  ;;  %v2496_v23 = vsel %vm2240_vm15, %v2112_v1, %v2368_v17  ;;  %v2117_v25 = vadd.f32 %v4614_v19, %v4688_v28 }
 0x17b   : > { %v2051_v29 = vadd.f32 %v4614_v19, %v4694_v32  ;;  %3917 = vst [vmem:[%s4463_s17 + $0xd8] sm:$0xff] %v3709_v20   ;;  %v3864_v30 = vpack.c.bf16 %v2496_v23, %v2495_v11  ;;  %vm2181_vm0 = vcmp.gt.f32.partialorder %v2053_v24, 0.0  ;;  %v2309_v27 = vmul.f32 0.2, %v2053_v24 }
 0x17c   : > { %3949 = vst [vmem:[%s4463_s17 + $0x1d8] sm:$0xff] %v3869_v21   ;;  %v2115_v31 = vadd.f32 %v4614_v19, %v4696_v35  ;;  %3916 = vst [vmem:[%s4463_s17 + $0xd0] sm:$0xff] %v3704_v8   ;;  %vm2245_vm1 = vcmp.gt.f32.partialorder %v2117_v25, 0.0  ;;  %v2373_v26 = vmul.f32 0.2, %v2117_v25  ;;  %v2054_v28 = vadd.f32 %v4614_v19, %v4700_v38 }
 0x17d   : > { %vm2179_vm2 = vcmp.gt.f32.partialorder %v2051_v29, 0.0  ;;  %v2307_v36 = vmul.f32 0.2, %v2051_v29  ;;  %3948 = vst [vmem:[%s4463_s17 + $0x1d0] sm:$0xff] %v3864_v30   ;;  %v2437_v37 = vsel %vm2181_vm0, %v2053_v24, %v2309_v27  ;;  %v2118_v42 = vadd.f32 %v4614_v19, %v4702_v41 }
 0x17e   : > { %vm2243_vm3 = vcmp.gt.f32.partialorder %v2115_v31, 0.0  ;;  %v2501_v32 = vsel %vm2245_vm1, %v2117_v25, %v2373_v26  ;;  %v2371_v33 = vmul.f32 0.2, %v2115_v31  ;;  %v2052_v34 = vadd.f32 %v4614_v19, %v4706_v45 }
 0x17f   : > { %v2435_v35 = vsel %vm2179_vm2, %v2051_v29, %v2307_v36  ;;  %vm2182_vm4 = vcmp.gt.f32.partialorder %v2054_v28, 0.0  ;;  %v2310_v39 = vmul.f32 0.2, %v2054_v28  ;;  %v2116_v43 = vadd.f32 %v4614_v19, %v4708_v46 }
 0x180   : > { %vm2246_vm5 = vcmp.gt.f32.partialorder %v2118_v42, 0.0  ;;  %v2374_v44 = vmul.f32 0.2, %v2118_v42  ;;  %vm2180_vm6 = vcmp.gt.f32.partialorder %v2052_v34, 0.0  ;;  %v2308_v40 = vmul.f32 0.2, %v2052_v34 }
 0x181   : > { %v2438_v38 = vsel %vm2182_vm4, %v2054_v28, %v2310_v39  ;;  %vm2244_vm7 = vcmp.gt.f32.partialorder %v2116_v43, 0.0  ;;  %v2372_v47 = vmul.f32 0.2, %v2116_v43  ;;  %v2057_v41 = vadd.f32 %v4614_v19, %v4713_v57 }
 0x182   : > { %v3719_v45 = vpack.c.bf16 %v2438_v38, %v2437_v37  ;;  %v2502_v48 = vsel %vm2246_vm5, %v2118_v42, %v2374_v44  ;;  %v2436_v49 = vsel %vm2180_vm6, %v2052_v34, %v2308_v40  ;;  %v2121_v50 = vadd.f32 %v4614_v19, %v4725_v61 }
 0x183   : > { %v2499_v46 = vsel %vm2243_vm3, %v2115_v31, %v2371_v33  ;;  %v3879_v51 = vpack.c.bf16 %v2502_v48, %v2501_v32  ;;  %v3714_v52 = vpack.c.bf16 %v2436_v49, %v2435_v35  ;;  %v2500_v53 = vsel %vm2244_vm7, %v2116_v43, %v2372_v47 }
 0x184   : > { %3919 = vst [vmem:[%s4463_s17 + $0xe8] sm:$0xff] %v3719_v45   ;;  %v3874_v54 = vpack.c.bf16 %v2500_v53, %v2499_v46  ;;  %vm2185_vm8 = vcmp.gt.f32.partialorder %v2057_v41, 0.0  ;;  %v2313_v55 = vmul.f32 0.2, %v2057_v41  ;;  %v2377_v58 = vmul.f32 0.2, %v2121_v50 }
 0x185   : > { %3951 = vst [vmem:[%s4463_s17 + $0x1e8] sm:$0xff] %v3879_v51   ;;  %3918 = vst [vmem:[%s4463_s17 + $0xe0] sm:$0xff] %v3714_v52   ;;  %v2055_v57 = vadd.f32 %v4614_v19, %v4727_v62  ;;  %v2119_v56 = vadd.f32 %v4614_v19, %v4735_v3  ;;  %v2058_v59 = vadd.f32 %v4614_v19, %v4737_v4  ;;  %vm2249_vm9 = vcmp.gt.f32.partialorder %v2121_v50, 0.0 }
 0x186   : > { %v2122_v60 = vadd.f32 %v4614_v19, %v4739_v12  ;;  %3950 = vst [vmem:[%s4463_s17 + $0x1e0] sm:$0xff] %v3874_v54   ;;  %v2056_v61 = vadd.f32 %v4614_v19, %v4741_v13  ;;  %v2120_v63 = vadd.f32 %v4614_v19, %v1589_v18  ;;  %v2441_v2 = vsel %vm2185_vm8, %v2057_v41, %v2313_v55 }
 0x187   : > { %vm2183_vm10 = vcmp.gt.f32.partialorder %v2055_v57, 0.0  ;;  %v2311_v0 = vmul.f32 0.2, %v2055_v57  ;;  %v2375_v62 = vmul.f32 0.2, %v2119_v56  ;;  %vm2186_vm11 = vcmp.gt.f32.partialorder %v2058_v59, 0.0 }
 0x188   : > { %v2314_v1 = vmul.f32 0.2, %v2058_v59  ;;  %vm2250_vm12 = vcmp.gt.f32.partialorder %v2122_v60, 0.0  ;;  %v2378_v3 = vmul.f32 0.2, %v2122_v60  ;;  %v2505_v4 = vsel %vm2249_vm9, %v2121_v50, %v2377_v58 }
 0x189   : > { %vm2247_vm13 = vcmp.gt.f32.partialorder %v2119_v56, 0.0  ;;  %vm2184_vm14 = vcmp.gt.f32.partialorder %v2056_v61, 0.0  ;;  %v2312_v5 = vmul.f32 0.2, %v2056_v61  ;;  %vm2248_vm15 = vcmp.gt.f32.partialorder %v2120_v63, 0.0 }
 0x18a   : > { %v2442_v6 = vsel %vm2186_vm11, %v2058_v59, %v2314_v1  ;;  %v2506_v7 = vsel %vm2250_vm12, %v2122_v60, %v2378_v3  ;;  %v2376_v19 = vmul.f32 0.2, %v2120_v63  ;;  %v2439_v9 = vsel %vm2183_vm10, %v2055_v57, %v2311_v0 }
 0x18b   : > { %v3729_v10 = vpack.c.bf16 %v2442_v6, %v2441_v2  ;;  %v3889_v11 = vpack.c.bf16 %v2506_v7, %v2505_v4  ;;  %v2440_v14 = vsel %vm2184_vm14, %v2056_v61, %v2312_v5  ;;  %v2503_v12 = vsel %vm2247_vm13, %v2119_v56, %v2375_v62 }
 0x18c   : > { %v3724_v13 = vpack.c.bf16 %v2440_v14, %v2439_v9  ;;  %v2504_v15 = vsel %vm2248_vm15, %v2120_v63, %v2376_v19 }
 0x18d   : > { %3921 = vst [vmem:[%s4463_s17 + $0xf8] sm:$0xff] %v3729_v10   ;;  %3953 = vst [vmem:[%s4463_s17 + $0x1f8] sm:$0xff] %v3889_v11   ;;  %v3884_v16 = vpack.c.bf16 %v2504_v15, %v2503_v12 }
 0x18e   : > { %3920 = vst [vmem:[%s4463_s17 + $0xf0] sm:$0xff] %v3724_v13  }
 0x18f   : > { %3952 = vst [vmem:[%s4463_s17 + $0x1f0] sm:$0xff] %v3884_v16  }
 0x190 PF: > { %s13_s14 = sadd.s32 1, %s4305_s14   ;;  %s4800_s12 = smov %s4301_s13 }
 0x191   : > { %p10_p5 = scmp.ge.s32.totalorder %s13_s14, 4   ;;  %s4801_s13 = smov %s4803_s15 }
 0x193   :  { %12 = sbr.rel (!%p10_p5) target bundleno = 2 (0x2), region = 73 }

// kernel: critic_forward.5
= control target key start
LH: loop header
LB: loop body
LE: loop exit
PB: predicated region body
PF: predicated region fallthrough
CT: control target
= control target key end

     0   :  { %s1510_s12 = smov 0   ;;  %s1512_s13 = smov 0   ;;  %s1702_s0 = inlined_call_operand.vmem [shape: bf16[512,128], index: 0, kind: input, shape index: {}]   ;;  %s1703_s1 = inlined_call_operand.vmem [shape: bf16[128,128], index: 1, kind: input, shape index: {}]   ;;  %s1704_s2 = inlined_call_operand.vmem [shape: bf16[512,128], index: 2, kind: output, shape index: {0}]   ;;  %s1705_s3 = inlined_call_operand.vmem [shape: f32[2,2,128], index: 3, kind: output, shape index: {1}]  }
   0x1   :  { %s1514_s14 = smov 0  }
   0x2 LB: > { %s26_s15 = sadd.s32 1, %s1484_s13  ;;  %p1139_p0 = scmp.ge.s32.totalorder %s1488_s14, 1  ;;  %s1488_s14 = sphi %s1514_s14, %s14_s14   ;;  %s1484_s13 = sphi %s1512_s13, %s1707_s13   ;;  %s1480_s12 = sphi %s1510_s12, %s1706_s12  }
   0x3   : > { %p28_p1 = scmp.ge.s32.totalorder %s26_s15, 2  ;;  %p169_p2 = scmp.lt.s32.totalorder %s1488_s14, 3 }
   0x5   : > { %s1709_s15 = smov (%p28_p1, %s26_s15), 0  ;;  %p170_p3 = pnand %p1139_p0, %p169_p2 }
   0x6   : > { %v1442_v0 = vld [vmem:[%s1703_s1] sm:$0xff] (!%p170_p3)   ;;  %s1140_s18 = sshll.u32 (!%p170_p3), %s1480_s12, 5  ;;  %v1443_v1 = vld [vmem:[%s1703_s1 + $0x8] sm:$0xff] (!%p170_p3)   ;;  %v1444_v2 = vld [vmem:[%s1703_s1 + $0x10] sm:$0xff] (!%p170_p3)   ;;  %p226_p5 = scmp.lt.s32.totalorder (!%p170_p3), %s1480_s12, 1  ;;  %vm1017_vm0 = vcmask (!%p170_p3), 1040384  }
   0x7   : > { %173 = sbr.rel (%p170_p3) target bundleno = 332 (0x14c), region = 28  ;;  %p206_p4 = scmp.lt.s32.totalorder (!%p170_p3), %s1140_s18, 63  ;;  %1354 = vmatprep.subr.bf16.mxu0 (!%p170_p3), %v1442_v0  ;;  %1402 = vmatprep.subr.bf16.mxu1 (!%p170_p3), %v1442_v0  ;;  %v1445_v3 = vld [vmem:[%s1703_s1 + $0x18] sm:$0xff] (!%p170_p3)   ;;  %v1446_v5 = vld [vmem:[%s1703_s1 + $0x20] sm:$0xff] (!%p170_p3)   ;;  %v1447_v6 = vld [vmem:[%s1703_s1 + $0x28] sm:$0xff] (!%p170_p3)  }
   0x8   : > { %1355 = vmatpush3.bf16.msra.mxu0 (!%p170_p3), %v1442_v0  ;;  %1410 = vmatpush3.bf16.msra.mxu1 (!%p170_p3), %v1442_v0  ;;  %v1448_v8 = vld [vmem:[%s1703_s1 + $0x30] sm:$0xff] (!%p170_p3)   ;;  %v1449_v9 = vld [vmem:[%s1703_s1 + $0x38] sm:$0xff] (!%p170_p3)  }
   0x9   : > { %1356 = vmatprep.subr.bf16.mxu0 (!%p170_p3), %v1443_v1  ;;  %1403 = vmatprep.subr.bf16.mxu1 (!%p170_p3), %v1443_v1 }
   0xc   : > { %1357 = vmatpush3.bf16.msra.mxu0 (!%p170_p3), %v1443_v1  ;;  %1411 = vmatpush3.bf16.msra.mxu1 (!%p170_p3), %v1443_v1 }
   0xd   : > { %1358 = vmatprep.subr.bf16.mxu0 (!%p170_p3), %v1444_v2  ;;  %1404 = vmatprep.subr.bf16.mxu1 (!%p170_p3), %v1444_v2 }
   0xe   : > { %s1711_s18 = smov (!%p206_p4, %s1140_s18), 63  ;;  %s1713_s12 = smov (!%p226_p5, %s1480_s12), 1 }
   0xf   : > { %s1141_s23 = sshll.u32 %s1711_s18, 2  ;;  %s1144_s17 = sshll.u32 %s1713_s12, 1 }
  0x10   : > { %s1548_s26 = scalar_lea.vmem %s1702_s0, %s1141_s23  ;;  %1359 = vmatpush3.bf16.msra.mxu0 %v1444_v2  ;;  %1412 = vmatpush3.bf16.msra.mxu1 %v1444_v2  ;;  %s1590_s16 = scalar_lea.vmem %s1704_s2, %s1141_s23 }
  0x11   : > { %v1450_v4 = vld [vmem:[%s1548_s26] sm:$0xff]   ;;  %1360 = vmatprep.subr.bf16.mxu0 %v1445_v3  ;;  %1405 = vmatprep.subr.bf16.mxu1 %v1445_v3  ;;  %v1451_v10 = vld [vmem:[%s1548_s26 + $0x8] sm:$0xff]   ;;  %v1452_v12 = vld [vmem:[%s1548_s26 + $0x10] sm:$0xff]   ;;  %s229_s20 = scalar_lea.vmem %s1705_s3, %s1144_s17 }
  0x12   : > { %1370 = vmatprep.mubr.bf16.mxu0 %v1450_v4  ;;  %v1458_v7 = vld [vmem:[%s1548_s26 + $0x40] sm:$0xff]   ;;  %v1459_v11 = vld [vmem:[%s1548_s26 + $0x48] sm:$0xff]   ;;  %v1460_v13 = vld [vmem:[%s1548_s26 + $0x50] sm:$0xff]  }
  0x13   : > { %1386 = vmatprep.mubr.bf16.mxu1 %v1458_v7  ;;  %v1453_v14 = vld [vmem:[%s1548_s26 + $0x18] sm:$0xff]   ;;  %v1454_v16 = vld [vmem:[%s1548_s26 + $0x20] sm:$0xff]   ;;  %v1455_v18 = vld [vmem:[%s1548_s26 + $0x28] sm:$0xff]  }
  0x14   : > { %1361 = vmatpush3.bf16.msra.mxu0 %v1445_v3  ;;  %1413 = vmatpush3.bf16.msra.mxu1 %v1445_v3  ;;  %v1461_v15 = vld [vmem:[%s1548_s26 + $0x58] sm:$0xff]   ;;  %v1462_v17 = vld [vmem:[%s1548_s26 + $0x60] sm:$0xff]   ;;  %v1463_v19 = vld [vmem:[%s1548_s26 + $0x68] sm:$0xff]  }
  0x15   : > { %1362 = vmatprep.subr.bf16.mxu0 %v1446_v5  ;;  %1406 = vmatprep.subr.bf16.mxu1 %v1446_v5  ;;  %v1456_v20 = vld [vmem:[%s1548_s26 + $0x30] sm:$0xff]   ;;  %v1457_v22 = vld [vmem:[%s1548_s26 + $0x38] sm:$0xff]  }
  0x16   : > { %v1464_v21 = vld [vmem:[%s1548_s26 + $0x70] sm:$0xff]   ;;  %v1465_v23 = vld [vmem:[%s1548_s26 + $0x78] sm:$0xff]  }
  0x18   : > { %1363 = vmatpush3.bf16.msra.mxu0 %v1446_v5  ;;  %1414 = vmatpush3.bf16.msra.mxu1 %v1446_v5 }
  0x19   : > { %1364 = vmatprep.subr.bf16.mxu0 %v1447_v6  ;;  %1407 = vmatprep.subr.bf16.mxu1 %v1447_v6 }
  0x1c   : > { %1365 = vmatpush3.bf16.msra.mxu0 %v1447_v6  ;;  %1415 = vmatpush3.bf16.msra.mxu1 %v1447_v6 }
  0x1d   : > { %1366 = vmatprep.subr.bf16.mxu0 %v1448_v8  ;;  %1408 = vmatprep.subr.bf16.mxu1 %v1448_v8 }
  0x20   : > { %1367 = vmatpush3.bf16.msra.mxu0 %v1448_v8  ;;  %1416 = vmatpush3.bf16.msra.mxu1 %v1448_v8 }
  0x21   : > { %1368 = vmatprep.subr.bf16.mxu0 %v1449_v9  ;;  %1409 = vmatprep.subr.bf16.mxu1 %v1449_v9 }
  0x24   : > { %1369 = vmatpush3.bf16.msra.mxu0 %v1449_v9  ;;  %1417 = vmatpush3.bf16.msra.mxu1 %v1449_v9 }
  0x27   : > { %1371 = vmatmul.mubr.bf16.vlgmr.msra.gmra.mrb[0].mxu0 %v1451_v10  ;;  %1387 = vmatmul.mubr.bf16.vlgmr.msra.gmra.mrb[0].mxu1 %v1459_v11 }
  0x28   : > { %1374 = vmatprep.mubr.bf16.mxu0 %v1452_v12  ;;  %1390 = vmatprep.mubr.bf16.mxu1 %v1460_v13 }
  0x2f   : > { %1375 = vmatmul.mubr.bf16.gmra.mrb[4].mxu0 %v1453_v14  ;;  %1391 = vmatmul.mubr.bf16.gmra.mrb[4].mxu1 %v1461_v15 }
  0x30   : > { %1378 = vmatprep.mubr.bf16.mxu0 %v1454_v16  ;;  %1394 = vmatprep.mubr.bf16.mxu1 %v1462_v17 }
  0x37   : > { %1379 = vmatmul.mubr.bf16.gmra.mrb[8].mxu0 %v1455_v18  ;;  %1395 = vmatmul.mubr.bf16.gmra.mrb[8].mxu1 %v1463_v19 }
  0x38   : > { %1382 = vmatprep.mubr.bf16.mxu0 %v1456_v20  ;;  %1398 = vmatprep.mubr.bf16.mxu1 %v1464_v21 }
  0x3f   : > { %1383 = vmatmul.mubr.bf16.gmra.mrb[12].mxu0 %v1457_v22  ;;  %1399 = vmatmul.mubr.bf16.gmra.mrb[12].mxu1 %v1465_v23 }
  0xfa   : > { %v1372_v24 = vpop.f32.mrb[0].mxu0  ;;  %v1581_v25 = vpop.f32.mrb[0].mxu1 }
  0xfb   : > { %v525_v26 = vpop.f32.mrb[1].mxu0  ;;  %v1583_v27 = vpop.f32.mrb[1].mxu1  ;;  %v950_v39 = vmul.f32 %v1372_v24, %v1372_v24 }
  0xfc   : > { %v1373_v28 = vpop.f32.mrb[2].mxu0  ;;  %v1592_v29 = vpop.f32.mrb[2].mxu1  ;;  %v948_v30 = vmul.f32 %v525_v26, %v525_v26 }
  0xfd   : > { %v1243_v31 = vpack.c.bf16 %v1373_v28, %v1372_v24  ;;  %v528_v32 = vpop.f32.mrb[3].mxu0  ;;  %v1283_v33 = vpack.c.bf16 %v1592_v29, %v1581_v25  ;;  %v1596_v34 = vpop.f32.mrb[3].mxu1  ;;  %v951_v42 = vmul.f32 %v1373_v28, %v1373_v28 }
  0xfe   : > { %v1238_v35 = vpack.c.bf16 %v528_v32, %v525_v26  ;;  %v911_v36 = vadd.f32 %v528_v32, %v525_v26  ;;  %v949_v37 = vmul.f32 %v528_v32, %v528_v32  ;;  %v1278_v38 = vpack.c.bf16 %v1596_v34, %v1583_v27 }
  0xff   : > { %1315 = vst [vmem:[%s1590_s16 + $0x8] sm:$0xff] %v1243_v31   ;;  %1323 = vst [vmem:[%s1590_s16 + $0x48] sm:$0xff] %v1283_v33  }
 0x100   : > { %1239 = vst [vmem:[%s1590_s16] sm:$0xff] %v1238_v35   ;;  %v912_v40 = vadd.f32 %v1372_v24, %v911_v36  ;;  %v980_v41 = vadd.f32 %v949_v37, %v948_v30  ;;  %1322 = vst [vmem:[%s1590_s16 + $0x40] sm:$0xff] %v1278_v38  }
 0x102   : > { %v981_v43 = vadd.f32 %v980_v41, %v950_v39  ;;  %v1376_v44 = vpop.f32.mrb[4].mxu0  ;;  %v913_v45 = vadd.f32 %v1373_v28, %v912_v40  ;;  %v1604_v46 = vpop.f32.mrb[4].mxu1 }
 0x103   : > { %v541_v47 = vpop.f32.mrb[5].mxu0  ;;  %v1606_v48 = vpop.f32.mrb[5].mxu1  ;;  %v954_v63 = vmul.f32 %v1376_v44, %v1376_v44 }
 0x104   : > { %v914_v49 = vadd.f32 %v913_v45, %v541_v47  ;;  %v952_v50 = vmul.f32 %v541_v47, %v541_v47  ;;  %v982_v51 = vadd.f32 %v981_v43, %v951_v42  ;;  %v1377_v52 = vpop.f32.mrb[6].mxu0  ;;  %v1608_v53 = vpop.f32.mrb[6].mxu1 }
 0x105   : > { %v1253_v54 = vpack.c.bf16 %v1377_v52, %v1376_v44  ;;  %v544_v55 = vpop.f32.mrb[7].mxu0  ;;  %v1293_v56 = vpack.c.bf16 %v1608_v53, %v1604_v46  ;;  %v1612_v57 = vpop.f32.mrb[7].mxu1  ;;  %v955_v2 = vmul.f32 %v1377_v52, %v1377_v52 }
 0x106   : > { %v983_v58 = vadd.f32 %v982_v51, %v952_v50  ;;  %v1248_v59 = vpack.c.bf16 %v544_v55, %v541_v47  ;;  %v915_v60 = vadd.f32 %v914_v49, %v544_v55  ;;  %v953_v61 = vmul.f32 %v544_v55, %v544_v55 }
 0x107   : > { %1317 = vst [vmem:[%s1590_s16 + $0x18] sm:$0xff] %v1253_v54   ;;  %1325 = vst [vmem:[%s1590_s16 + $0x58] sm:$0xff] %v1293_v56   ;;  %v1288_v62 = vpack.c.bf16 %v1612_v57, %v1606_v48 }
 0x108   : > { %1316 = vst [vmem:[%s1590_s16 + $0x10] sm:$0xff] %v1248_v59   ;;  %v916_v0 = vadd.f32 %v1376_v44, %v915_v60  ;;  %v984_v1 = vadd.f32 %v983_v58, %v953_v61  ;;  %v964_v61 = vmul.f32 %v1583_v27, %v1583_v27 }
 0x109   : > { %1324 = vst [vmem:[%s1590_s16 + $0x50] sm:$0xff] %v1288_v62  }
 0x10a   : > { %v985_v3 = vadd.f32 %v984_v1, %v954_v63  ;;  %v1380_v4 = vpop.f32.mrb[8].mxu0  ;;  %v917_v5 = vadd.f32 %v1377_v52, %v916_v0  ;;  %v1620_v6 = vpop.f32.mrb[8].mxu1 }
 0x10b   : > { %v557_v7 = vpop.f32.mrb[9].mxu0  ;;  %v1622_v8 = vpop.f32.mrb[9].mxu1  ;;  %v958_v23 = vmul.f32 %v1380_v4, %v1380_v4 }
 0x10c   : > { %v918_v9 = vadd.f32 %v917_v5, %v557_v7  ;;  %v956_v10 = vmul.f32 %v557_v7, %v557_v7  ;;  %v986_v11 = vadd.f32 %v985_v3, %v955_v2  ;;  %v1381_v12 = vpop.f32.mrb[10].mxu0  ;;  %v1624_v13 = vpop.f32.mrb[10].mxu1  ;;  %v965_v2 = vmul.f32 %v1596_v34, %v1596_v34 }
 0x10d   : > { %v1263_v14 = vpack.c.bf16 %v1381_v12, %v1380_v4  ;;  %v560_v15 = vpop.f32.mrb[11].mxu0  ;;  %v1303_v16 = vpack.c.bf16 %v1624_v13, %v1620_v6  ;;  %v1628_v17 = vpop.f32.mrb[11].mxu1  ;;  %v959_v28 = vmul.f32 %v1381_v12, %v1381_v12  ;;  %v966_v3 = vmul.f32 %v1581_v25, %v1581_v25 }
 0x10e   : > { %v987_v18 = vadd.f32 %v986_v11, %v956_v10  ;;  %v1258_v19 = vpack.c.bf16 %v560_v15, %v557_v7  ;;  %v919_v20 = vadd.f32 %v918_v9, %v560_v15  ;;  %v957_v21 = vmul.f32 %v560_v15, %v560_v15 }
 0x10f   : > { %1319 = vst [vmem:[%s1590_s16 + $0x28] sm:$0xff] %v1263_v14   ;;  %1327 = vst [vmem:[%s1590_s16 + $0x68] sm:$0xff] %v1303_v16   ;;  %v1298_v22 = vpack.c.bf16 %v1628_v17, %v1622_v8  ;;  %v967_v7 = vmul.f32 %v1592_v29, %v1592_v29  ;;  %v969_v15 = vmul.f32 %v1612_v57, %v1612_v57 }
 0x110   : > { %1318 = vst [vmem:[%s1590_s16 + $0x20] sm:$0xff] %v1258_v19   ;;  %v920_v24 = vadd.f32 %v1380_v4, %v919_v20  ;;  %v988_v26 = vadd.f32 %v987_v18, %v957_v21 }
 0x111   : > { %1326 = vst [vmem:[%s1590_s16 + $0x60] sm:$0xff] %v1298_v22  }
 0x112   : > { %v989_v30 = vadd.f32 %v988_v26, %v958_v23  ;;  %v1384_v31 = vpop.f32.mrb[12].mxu0  ;;  %v921_v32 = vadd.f32 %v1381_v12, %v920_v24  ;;  %v1636_v33 = vpop.f32.mrb[12].mxu1  ;;  %v973_v24 = vmul.f32 %v1628_v17, %v1628_v17 }
 0x113   : > { %v573_v35 = vpop.f32.mrb[13].mxu0  ;;  %v637_v36 = vpop.f32.mrb[13].mxu1  ;;  %v962_v54 = vmul.f32 %v1384_v31, %v1384_v31 }
 0x114   : > { %v922_v37 = vadd.f32 %v921_v32, %v573_v35  ;;  %v960_v38 = vmul.f32 %v573_v35, %v573_v35  ;;  %v990_v39 = vadd.f32 %v989_v30, %v959_v28  ;;  %v1385_v40 = vpop.f32.mrb[14].mxu0  ;;  %v1638_v41 = vpop.f32.mrb[14].mxu1 }
 0x115   : > { %v1273_v42 = vpack.c.bf16 %v1385_v40, %v1384_v31  ;;  %v576_v43 = vpop.f32.mrb[15].mxu0  ;;  %v1313_v44 = vpack.c.bf16 %v1638_v41, %v1636_v33  ;;  %v640_v45 = vpop.f32.mrb[15].mxu1  ;;  %v963_v58 = vmul.f32 %v1385_v40, %v1385_v40 }
 0x116   : > { %v991_v47 = vadd.f32 %v990_v39, %v960_v38  ;;  %v1268_v49 = vpack.c.bf16 %v576_v43, %v573_v35  ;;  %v923_v50 = vadd.f32 %v922_v37, %v576_v43  ;;  %v961_v51 = vmul.f32 %v576_v43, %v576_v43 }
 0x117   : > { %1321 = vst [vmem:[%s1590_s16 + $0x38] sm:$0xff] %v1273_v42   ;;  %1329 = vst [vmem:[%s1590_s16 + $0x78] sm:$0xff] %v1313_v44   ;;  %v1308_v52 = vpack.c.bf16 %v640_v45, %v637_v36  ;;  %v978_v39 = vmul.f32 %v1636_v33, %v1636_v33  ;;  %v979_v42 = vmul.f32 %v1638_v41, %v1638_v41 }
 0x118   : > { %1320 = vst [vmem:[%s1590_s16 + $0x30] sm:$0xff] %v1268_v49   ;;  %v924_v55 = vadd.f32 %v1384_v31, %v923_v50  ;;  %v992_v56 = vadd.f32 %v991_v47, %v961_v51  ;;  %v976_v31 = vmul.f32 %v637_v36, %v637_v36 }
 0x119   : > { %1328 = vst [vmem:[%s1590_s16 + $0x70] sm:$0xff] %v1308_v52  }
 0x11a   : > { %v993_v59 = vadd.f32 %v992_v56, %v962_v54  ;;  %v925_v60 = vadd.f32 %v1385_v40, %v924_v55 }
 0x11c   : > { %v926_v62 = vadd.f32 %v925_v60, %v1583_v27  ;;  %v994_v63 = vadd.f32 %v993_v59, %v963_v58  ;;  %v968_v27 = vmul.f32 %v1606_v48, %v1606_v48 }
 0x11e   : > { %v995_v0 = vadd.f32 %v994_v63, %v964_v61  ;;  %v927_v1 = vadd.f32 %v926_v62, %v1596_v34 }
 0x120   : > { %v928_v4 = vadd.f32 %v1581_v25, %v927_v1  ;;  %v996_v5 = vadd.f32 %v995_v0, %v965_v2  ;;  %v970_v25 = vmul.f32 %v1604_v46, %v1604_v46 }
 0x122   : > { %v997_v9 = vadd.f32 %v996_v5, %v966_v3  ;;  %v929_v10 = vadd.f32 %v1592_v29, %v928_v4  ;;  %v971_v29 = vmul.f32 %v1608_v53, %v1608_v53 }
 0x124   : > { %v930_v11 = vadd.f32 %v929_v10, %v1606_v48  ;;  %v998_v12 = vadd.f32 %v997_v9, %v967_v7  ;;  %v972_v48 = vmul.f32 %v1622_v8, %v1622_v8 }
 0x126   : > { %v999_v14 = vadd.f32 %v998_v12, %v968_v27  ;;  %v931_v34 = vadd.f32 %v930_v11, %v1612_v57 }
 0x128   : > { %v932_v16 = vadd.f32 %v1604_v46, %v931_v34  ;;  %v1000_v18 = vadd.f32 %v999_v14, %v969_v15  ;;  %v974_v46 = vmul.f32 %v1620_v6, %v1620_v6 }
 0x12a   : > { %v1001_v19 = vadd.f32 %v1000_v18, %v970_v25  ;;  %v933_v20 = vadd.f32 %v1608_v53, %v932_v16  ;;  %v975_v53 = vmul.f32 %v1624_v13, %v1624_v13 }
 0x12c   : > { %v934_v21 = vadd.f32 %v933_v20, %v1622_v8  ;;  %v1002_v22 = vadd.f32 %v1001_v19, %v971_v29 }
 0x12e   : > { %v1003_v23 = vadd.f32 %v1002_v22, %v972_v48  ;;  %v935_v57 = vadd.f32 %v934_v21, %v1628_v17  ;;  %v977_v17 = vmul.f32 %v640_v45, %v640_v45 }
 0x130   : > { %v936_v26 = vadd.f32 %v1620_v6, %v935_v57  ;;  %v1004_v28 = vadd.f32 %v1003_v23, %v973_v24 }
 0x132   : > { %v1005_v30 = vadd.f32 %v1004_v28, %v974_v46  ;;  %v937_v8 = vadd.f32 %v1624_v13, %v936_v26 }
 0x134   : > { %v938_v32 = vadd.f32 %v937_v8, %v637_v36  ;;  %v1006_v35 = vadd.f32 %v1005_v30, %v975_v53 }
 0x136   : > { %v1007_v37 = vadd.f32 %v1006_v35, %v976_v31  ;;  %v939_v38 = vadd.f32 %v938_v32, %v640_v45 }
 0x138   : > { %v940_v6 = vadd.f32 %v1636_v33, %v939_v38  ;;  %v1008_v40 = vadd.f32 %v1007_v37, %v977_v17 }
 0x13a   : > { %v941_v43 = vadd.f32 %v1638_v41, %v940_v6  ;;  %v1009_v44 = vadd.f32 %v1008_v40, %v978_v39 }
 0x13c   : > { %v942_v13 = vrot.slane %v941_v43, 4  ;;  %v1010_v47 = vadd.f32 %v1009_v44, %v979_v42 }
 0x13e   : > { %v943_v36 = vadd.f32 %v942_v13, %v941_v43  ;;  %v1011_v49 = vrot.slane %v1010_v47, 4 }
 0x140   : > { %v944_v50 = vrot.slane %v943_v36, 2  ;;  %v1012_v51 = vadd.f32 %v1011_v49, %v1010_v47 }
 0x142   : > { %v945_v45 = vadd.f32 %v944_v50, %v943_v36  ;;  %v1013_v52 = vrot.slane %v1012_v51, 2 }
 0x144   : > { %v946_v54 = vrot.slane %v945_v45, 1  ;;  %v1014_v55 = vadd.f32 %v1013_v52, %v1012_v51 }
 0x146   : > { %v1015_v33 = vrot.slane %v1014_v55, 1  ;;  %v947_v41 = vadd.f32 %v946_v54, %v945_v45 }
 0x148   : > { %v1016_v56 = vadd.f32 %v1015_v33, %v1014_v55 }
 0x14a   : > { %v1018_v58 = vsel %vm1017_vm0, %v947_v41, %v1016_v56 }
 0x14b   : > { %1019 = vst [vmem:[%s229_s20] sm:$0x3] %v1018_v58 }
 0x14c PF: > { %s14_s14 = sadd.s32 1, %s1488_s14   ;;  %s1706_s12 = smov %s1484_s13 }
 0x14d   : > { %p11_p6 = scmp.ge.s32.totalorder %s14_s14, 4   ;;  %s1707_s13 = smov %s1709_s15 }
 0x14f   :  { %13 = sbr.rel (!%p11_p6) target bundleno = 2 (0x2), region = 81 }

// kernel: critic_forward.6
= control target key start
LH: loop header
LB: loop body
LE: loop exit
PB: predicated region body
PF: predicated region fallthrough
CT: control target
= control target key end

     0   :  { %s951_s12 = smov 0   ;;  %s953_s13 = smov 0   ;;  %s1060_s0 = inlined_call_operand.vmem [shape: bf16[128,256], index: 0, kind: input, shape index: {}]   ;;  %s1061_s1 = inlined_call_operand.vmem [shape: bf16[256,128], index: 1, kind: input, shape index: {}]   ;;  %s1062_s2 = inlined_call_operand.vmem [shape: bf16[128,128], index: 2, kind: output, shape index: {0}]   ;;  %s1063_s3 = inlined_call_operand.vmem [shape: f32[2,2,128], index: 3, kind: output, shape index: {1}]  }
   0x1   :  { %s955_s14 = smov 0  }
   0x2 LB: > { %s26_s15 = sadd.s32 1, %s925_s13  ;;  %p726_p0 = scmp.ge.s32.totalorder %s929_s14, 1  ;;  %s929_s14 = sphi %s955_s14, %s14_s14   ;;  %s925_s13 = sphi %s953_s13, %s1065_s13   ;;  %s921_s12 = sphi %s951_s12, %s1064_s12  }
   0x3   : > { %p28_p1 = scmp.ge.s32.totalorder %s26_s15, 2  ;;  %p172_p2 = scmp.lt.s32.totalorder %s929_s14, 3 }
   0x5   : > { %s1067_s15 = smov (%p28_p1, %s26_s15), 0  ;;  %p173_p3 = pnand %p726_p0, %p172_p2 }
   0x6   : > { %v879_v0 = vld [vmem:[%s1061_s1 + $0x40] sm:$0xff] (!%p173_p3)   ;;  %s727_s18 = sshll.u32 (!%p173_p3), %s921_s12, 3  ;;  %v881_v2 = vld [vmem:[%s1061_s1 + $0x48] sm:$0xff] (!%p173_p3)   ;;  %v883_v4 = vld [vmem:[%s1061_s1 + $0x50] sm:$0xff] (!%p173_p3)   ;;  %p234_p5 = scmp.lt.s32.totalorder (!%p173_p3), %s921_s12, 1  ;;  %vm601_vm0 = vcmask (!%p173_p3), 1040384  }
   0x7   : > { %176 = sbr.rel (%p173_p3) target bundleno = 290 (0x122), region = 28  ;;  %v880_v1 = vld [vmem:[%s1061_s1] sm:$0xff] (!%p173_p3)   ;;  %799 = vmatprep.subr.bf16.mxu0 (!%p173_p3), %v879_v0  ;;  %839 = vmatprep.subr.bf16.mxu1 (!%p173_p3), %v879_v0  ;;  %v882_v3 = vld [vmem:[%s1061_s1 + $0x8] sm:$0xff] (!%p173_p3)   ;;  %p212_p4 = scmp.lt.s32.totalorder (!%p173_p3), %s727_s18, 15  ;;  %v884_v5 = vld [vmem:[%s1061_s1 + $0x10] sm:$0xff] (!%p173_p3)  }
   0x8   : > { %800 = vmatpush3.bf16.msra.mxu0 (!%p173_p3), %v880_v1  ;;  %847 = vmatpush3.bf16.msra.mxu1 (!%p173_p3), %v880_v1  ;;  %v885_v6 = vld [vmem:[%s1061_s1 + $0x58] sm:$0xff] (!%p173_p3)   ;;  %v887_v8 = vld [vmem:[%s1061_s1 + $0x60] sm:$0xff] (!%p173_p3)   ;;  %v889_v10 = vld [vmem:[%s1061_s1 + $0x68] sm:$0xff] (!%p173_p3)  }
   0x9   : > { %801 = vmatprep.subr.bf16.mxu0 (!%p173_p3), %v881_v2  ;;  %840 = vmatprep.subr.bf16.mxu1 (!%p173_p3), %v881_v2  ;;  %v886_v7 = vld [vmem:[%s1061_s1 + $0x18] sm:$0xff] (!%p173_p3)   ;;  %v888_v9 = vld [vmem:[%s1061_s1 + $0x20] sm:$0xff] (!%p173_p3)   ;;  %v890_v13 = vld [vmem:[%s1061_s1 + $0x28] sm:$0xff] (!%p173_p3)  }
   0xa   : > { %v891_v14 = vld [vmem:[%s1061_s1 + $0x70] sm:$0xff] (!%p173_p3)   ;;  %v893_v16 = vld [vmem:[%s1061_s1 + $0x78] sm:$0xff] (!%p173_p3)  }
   0xb   : > { %v892_v15 = vld [vmem:[%s1061_s1 + $0x30] sm:$0xff] (!%p173_p3)   ;;  %v894_v17 = vld [vmem:[%s1061_s1 + $0x38] sm:$0xff] (!%p173_p3)  }
   0xc   : > { %802 = vmatpush3.bf16.msra.mxu0 (!%p173_p3), %v882_v3  ;;  %848 = vmatpush3.bf16.msra.mxu1 (!%p173_p3), %v882_v3 }
   0xd   : > { %803 = vmatprep.subr.bf16.mxu0 (!%p173_p3), %v883_v4  ;;  %841 = vmatprep.subr.bf16.mxu1 (!%p173_p3), %v883_v4 }
   0xe   : > { %s1069_s18 = smov (!%p212_p4, %s727_s18), 15  ;;  %s1071_s12 = smov (!%p234_p5, %s921_s12), 1 }
   0xf   : > { %s767_s6 = sshll.u32 %s1069_s18, 3  ;;  %s731_s4 = sshll.u32 %s1069_s18, 2 }
  0x10   : > { %804 = vmatpush3.bf16.msra.mxu0 %v884_v5  ;;  %849 = vmatpush3.bf16.msra.mxu1 %v884_v5  ;;  %s1005_s11 = scalar_lea.vmem %s1060_s0, %s767_s6  ;;  %s1040_s7 = scalar_lea.vmem %s1062_s2, %s731_s4 }
  0x11   : > { %805 = vmatprep.subr.bf16.mxu0 %v885_v6  ;;  %842 = vmatprep.subr.bf16.mxu1 %v885_v6  ;;  %v897_v11 = vld [vmem:[%s1005_s11 + $0x4] ss:$8 sps:$4 sm:$0xff]   ;;  %v895_v18 = vld [vmem:[%s1005_s11] ss:$8 sps:$4 sm:$0xff]   ;;  %v901_v20 = vld [vmem:[%s1005_s11 + $0x14] ss:$8 sps:$4 sm:$0xff]  }
  0x12   : > { %v900_v12 = vld [vmem:[%s1005_s11 + $0x24] ss:$8 sps:$4 sm:$0xff]   ;;  %467 = vmatprep.mubr.bf16.mxu0 %v897_v11  ;;  %v898_v19 = vld [vmem:[%s1005_s11 + $0x20] ss:$8 sps:$4 sm:$0xff]   ;;  %v904_v21 = vld [vmem:[%s1005_s11 + $0x34] ss:$8 sps:$4 sm:$0xff]  }
  0x13   : > { %483 = vmatprep.mubr.bf16.mxu1 %v900_v12  ;;  %v903_v22 = vld [vmem:[%s1005_s11 + $0x10] ss:$8 sps:$4 sm:$0xff]   ;;  %s732_s18 = sshll.u32 %s1071_s12, 1 }
  0x14   : > { %806 = vmatpush3.bf16.msra.mxu0 %v886_v7  ;;  %850 = vmatpush3.bf16.msra.mxu1 %v886_v7  ;;  %v906_v23 = vld [vmem:[%s1005_s11 + $0x30] ss:$8 sps:$4 sm:$0xff]   ;;  %s237_s10 = scalar_lea.vmem %s1063_s3, %s732_s18 }
  0x15   : > { %807 = vmatprep.subr.bf16.mxu0 %v887_v8  ;;  %843 = vmatprep.subr.bf16.mxu1 %v887_v8 }
  0x18   : > { %808 = vmatpush3.bf16.msra.mxu0 %v888_v9  ;;  %851 = vmatpush3.bf16.msra.mxu1 %v888_v9 }
  0x19   : > { %809 = vmatprep.subr.bf16.mxu0 %v889_v10  ;;  %844 = vmatprep.subr.bf16.mxu1 %v889_v10 }
  0x1c   : > { %810 = vmatpush3.bf16.msra.mxu0 %v890_v13  ;;  %852 = vmatpush3.bf16.msra.mxu1 %v890_v13 }
  0x1d   : > { %811 = vmatprep.subr.bf16.mxu0 %v891_v14  ;;  %845 = vmatprep.subr.bf16.mxu1 %v891_v14 }
  0x20   : > { %812 = vmatpush3.bf16.msra.mxu0 %v892_v15  ;;  %853 = vmatpush3.bf16.msra.mxu1 %v892_v15 }
  0x21   : > { %813 = vmatprep.subr.bf16.mxu0 %v893_v16  ;;  %846 = vmatprep.subr.bf16.mxu1 %v893_v16 }
  0x24   : > { %814 = vmatpush3.bf16.msra.mxu0 %v894_v17  ;;  %854 = vmatpush3.bf16.msra.mxu1 %v894_v17 }
  0x27   : > { %468 = vmatmul.mubr.bf16.vlgmr.msra.gmra.mrb[0].mxu0 %v895_v18  ;;  %484 = vmatmul.mubr.bf16.vlgmr.msra.gmra.mrb[0].mxu1 %v898_v19 }
  0x28   : > { %475 = vmatprep.mubr.bf16.mxu0 %v901_v20  ;;  %491 = vmatprep.mubr.bf16.mxu1 %v904_v21 }
  0x2f   : > { %476 = vmatmul.mubr.bf16.gmra.mrb[4].mxu0 %v903_v22  ;;  %492 = vmatmul.mubr.bf16.gmra.mrb[4].mxu1 %v906_v23 }
  0xfa   : > { %v815_v24 = vpop.f32.mrb[0].mxu0  ;;  %v827_v25 = vpop.f32.mrb[0].mxu1 }
  0xfb   : > { %v816_v26 = vpop.f32.mrb[1].mxu0  ;;  %v828_v27 = vpop.f32.mrb[1].mxu1 }
  0xfc   : > { %v817_v28 = vadd.f32 %v816_v26, %v815_v24  ;;  %v818_v29 = vpop.f32.mrb[2].mxu0  ;;  %v829_v30 = vadd.f32 %v828_v27, %v827_v25  ;;  %v830_v31 = vpop.f32.mrb[2].mxu1 }
  0xfd   : > { %v819_v32 = vpop.f32.mrb[3].mxu0  ;;  %v831_v33 = vpop.f32.mrb[3].mxu1 }
  0xfe   : > { %v820_v34 = vadd.f32 %v819_v32, %v818_v29  ;;  %v832_v35 = vadd.f32 %v831_v33, %v830_v31  ;;  %v580_v36 = vmul.f32 %v817_v28, %v817_v28  ;;  %v584_v61 = vmul.f32 %v829_v30, %v829_v30 }
 0x100   : > { %v779_v37 = vpack.c.bf16 %v820_v34, %v817_v28  ;;  %v567_v38 = vadd.f32 %v820_v34, %v817_v28  ;;  %v581_v39 = vmul.f32 %v820_v34, %v820_v34  ;;  %v789_v40 = vpack.c.bf16 %v832_v35, %v829_v30 }
 0x101   : > { %v585_v0 = vmul.f32 %v832_v35, %v832_v35 }
 0x102   : > { %780 = vst [vmem:[%s1040_s7] sm:$0xff] %v779_v37   ;;  %v588_v41 = vadd.f32 %v581_v39, %v580_v36  ;;  %v821_v42 = vpop.f32.mrb[4].mxu0  ;;  %797 = vst [vmem:[%s1040_s7 + $0x10] sm:$0xff] %v789_v40   ;;  %v833_v43 = vpop.f32.mrb[4].mxu1 }
 0x103   : > { %v822_v44 = vpop.f32.mrb[5].mxu0  ;;  %v834_v45 = vpop.f32.mrb[5].mxu1 }
 0x104   : > { %v823_v46 = vadd.f32 %v822_v44, %v821_v42  ;;  %v824_v47 = vpop.f32.mrb[6].mxu0  ;;  %v835_v48 = vadd.f32 %v834_v45, %v833_v43  ;;  %v836_v49 = vpop.f32.mrb[6].mxu1 }
 0x105   : > { %v825_v50 = vpop.f32.mrb[7].mxu0  ;;  %v837_v51 = vpop.f32.mrb[7].mxu1 }
 0x106   : > { %v568_v52 = vadd.f32 %v823_v46, %v567_v38  ;;  %v582_v53 = vmul.f32 %v823_v46, %v823_v46  ;;  %v826_v54 = vadd.f32 %v825_v50, %v824_v47  ;;  %v838_v55 = vadd.f32 %v837_v51, %v836_v49 }
 0x107   : > { %v586_v3 = vmul.f32 %v835_v48, %v835_v48 }
 0x108   : > { %v589_v56 = vadd.f32 %v588_v41, %v582_v53  ;;  %v784_v57 = vpack.c.bf16 %v826_v54, %v823_v46  ;;  %v569_v58 = vadd.f32 %v826_v54, %v568_v52  ;;  %v583_v59 = vmul.f32 %v826_v54, %v826_v54 }
 0x109   : > { %v794_v60 = vpack.c.bf16 %v838_v55, %v835_v48  ;;  %v587_v8 = vmul.f32 %v838_v55, %v838_v55 }
 0x10a   : > { %796 = vst [vmem:[%s1040_s7 + $0x8] sm:$0xff] %v784_v57   ;;  %v570_v62 = vadd.f32 %v829_v30, %v569_v58  ;;  %v590_v63 = vadd.f32 %v589_v56, %v583_v59 }
 0x10b   : > { %798 = vst [vmem:[%s1040_s7 + $0x18] sm:$0xff] %v794_v60  }
 0x10c   : > { %v591_v1 = vadd.f32 %v590_v63, %v584_v61  ;;  %v571_v2 = vadd.f32 %v832_v35, %v570_v62 }
 0x10e   : > { %v572_v4 = vadd.f32 %v835_v48, %v571_v2  ;;  %v592_v5 = vadd.f32 %v591_v1, %v585_v0 }
 0x110   : > { %v593_v6 = vadd.f32 %v592_v5, %v586_v3  ;;  %v573_v7 = vadd.f32 %v838_v55, %v572_v4 }
 0x112   : > { %v574_v9 = vrot.slane %v573_v7, 4  ;;  %v594_v10 = vadd.f32 %v593_v6, %v587_v8 }
 0x114   : > { %v575_v11 = vadd.f32 %v574_v9, %v573_v7  ;;  %v595_v12 = vrot.slane %v594_v10, 4 }
 0x116   : > { %v576_v13 = vrot.slane %v575_v11, 2  ;;  %v596_v14 = vadd.f32 %v595_v12, %v594_v10 }
 0x118   : > { %v577_v15 = vadd.f32 %v576_v13, %v575_v11  ;;  %v597_v16 = vrot.slane %v596_v14, 2 }
 0x11a   : > { %v578_v17 = vrot.slane %v577_v15, 1  ;;  %v598_v18 = vadd.f32 %v597_v16, %v596_v14 }
 0x11c   : > { %v599_v19 = vrot.slane %v598_v18, 1  ;;  %v579_v20 = vadd.f32 %v578_v17, %v577_v15 }
 0x11e   : > { %v600_v21 = vadd.f32 %v599_v19, %v598_v18 }
 0x120   : > { %v602_v22 = vsel %vm601_vm0, %v579_v20, %v600_v21 }
 0x121   : > { %603 = vst [vmem:[%s237_s10] sm:$0x3] %v602_v22 }
 0x122 PF: > { %s14_s14 = sadd.s32 1, %s929_s14   ;;  %s1064_s12 = smov %s925_s13 }
 0x123   : > { %p11_p6 = scmp.ge.s32.totalorder %s14_s14, 4   ;;  %s1065_s13 = smov %s1067_s15 }
 0x125   :  { %13 = sbr.rel (!%p11_p6) target bundleno = 2 (0x2), region = 81 }

// kernel: critic_forward.7
= control target key start
LH: loop header
LB: loop body
LE: loop exit
PB: predicated region body
PF: predicated region fallthrough
CT: control target
= control target key end

     0   :  { %s974_s12 = smov 0   ;;  %s976_s13 = smov 0   ;;  %s1115_s0 = inlined_call_operand.vmem [shape: bf16[32,512], index: 0, kind: input, shape index: {}]   ;;  %s1116_s1 = inlined_call_operand.vmem [shape: bf16[512,128], index: 1, kind: input, shape index: {}]   ;;  %s1117_s2 = inlined_call_operand.vmem [shape: bf16[32,128], index: 2, kind: output, shape index: {0}]   ;;  %s1118_s3 = inlined_call_operand.vmem [shape: f32[2,2,128], index: 3, kind: output, shape index: {1}]  }
   0x1   :  { %s978_s14 = smov 0  }
   0x2 LB: > { %s26_s15 = sadd.s32 1, %s948_s13  ;;  %p769_p0 = scmp.ge.s32.totalorder %s952_s14, 1  ;;  %s952_s14 = sphi %s978_s14, %s14_s14   ;;  %s948_s13 = sphi %s976_s13, %s1120_s13   ;;  %s944_s12 = sphi %s974_s12, %s1119_s12  }
   0x3   : > { %p28_p1 = scmp.ge.s32.totalorder %s26_s15, 2  ;;  %p172_p2 = scmp.lt.s32.totalorder %s952_s14, 3 }
   0x5   : > { %s1122_s15 = smov (%p28_p1, %s26_s15), 0  ;;  %p173_p3 = pnand %p769_p0, %p172_p2 }
   0x6   : > { %v892_v0 = vld [vmem:[%s1116_s1 + $0x40] sm:$0xff] (!%p173_p3)   ;;  %v896_v4 = vld [vmem:[%s1116_s1 + $0x48] sm:$0xff] (!%p173_p3)   ;;  %v900_v8 = vld [vmem:[%s1116_s1 + $0x50] sm:$0xff] (!%p173_p3)   ;;  %s770_s25 = sshll.u32 (!%p173_p3), %s944_s12, 1  ;;  %p234_p5 = scmp.lt.s32.totalorder (!%p173_p3), %s944_s12, 1  ;;  %vm644_vm0 = vcmask (!%p173_p3), 1040384  }
   0x7   : > { %176 = sbr.rel (%p173_p3) target bundleno = 278 (0x116), region = 28  ;;  %v893_v1 = vld [vmem:[%s1116_s1 + $0xc0] sm:$0xff] (!%p173_p3)   ;;  %824 = vmatprep.subr.bf16.mxu0 (!%p173_p3), %v892_v0  ;;  %v897_v5 = vld [vmem:[%s1116_s1 + $0xc8] sm:$0xff] (!%p173_p3)   ;;  %v901_v9 = vld [vmem:[%s1116_s1 + $0xd0] sm:$0xff] (!%p173_p3)   ;;  %p212_p4 = scmp.lt.s32.totalorder (!%p173_p3), %s770_s25, 3 }
   0x8   : > { %v894_v2 = vld [vmem:[%s1116_s1] sm:$0xff] (!%p173_p3)   ;;  %846 = vmatprep.subr.bf16.mxu1 (!%p173_p3), %v893_v1  ;;  %v898_v6 = vld [vmem:[%s1116_s1 + $0x8] sm:$0xff] (!%p173_p3)   ;;  %v902_v10 = vld [vmem:[%s1116_s1 + $0x10] sm:$0xff] (!%p173_p3)  }
   0x9   : > { %v895_v3 = vld [vmem:[%s1116_s1 + $0x80] sm:$0xff] (!%p173_p3)   ;;  %825 = vmatpush3.bf16.msra.mxu0 (!%p173_p3), %v894_v2  ;;  %v899_v7 = vld [vmem:[%s1116_s1 + $0x88] sm:$0xff] (!%p173_p3)   ;;  %v903_v11 = vld [vmem:[%s1116_s1 + $0x90] sm:$0xff] (!%p173_p3)  }
   0xa   : > { %847 = vmatpush3.bf16.msra.mxu1 (!%p173_p3), %v895_v3  ;;  %826 = vmatprep.subr.bf16.mxu0 (!%p173_p3), %v896_v4  ;;  %v904_v12 = vld [vmem:[%s1116_s1 + $0x58] sm:$0xff] (!%p173_p3)   ;;  %v908_v16 = vld [vmem:[%s1116_s1 + $0x60] sm:$0xff] (!%p173_p3)   ;;  %v912_v20 = vld [vmem:[%s1116_s1 + $0x68] sm:$0xff] (!%p173_p3)  }
   0xb   : > { %848 = vmatprep.subr.bf16.mxu1 (!%p173_p3), %v897_v5  ;;  %v905_v13 = vld [vmem:[%s1116_s1 + $0xd8] sm:$0xff] (!%p173_p3)   ;;  %v909_v17 = vld [vmem:[%s1116_s1 + $0xe0] sm:$0xff] (!%p173_p3)   ;;  %v913_v21 = vld [vmem:[%s1116_s1 + $0xe8] sm:$0xff] (!%p173_p3)  }
   0xc   : > { %v906_v14 = vld [vmem:[%s1116_s1 + $0x18] sm:$0xff] (!%p173_p3)   ;;  %v910_v18 = vld [vmem:[%s1116_s1 + $0x20] sm:$0xff] (!%p173_p3)   ;;  %v914_v22 = vld [vmem:[%s1116_s1 + $0x28] sm:$0xff] (!%p173_p3)  }
   0xd   : > { %827 = vmatpush3.bf16.msra.mxu0 (!%p173_p3), %v898_v6  ;;  %v907_v15 = vld [vmem:[%s1116_s1 + $0x98] sm:$0xff] (!%p173_p3)   ;;  %v911_v19 = vld [vmem:[%s1116_s1 + $0xa0] sm:$0xff] (!%p173_p3)   ;;  %v915_v23 = vld [vmem:[%s1116_s1 + $0xa8] sm:$0xff] (!%p173_p3)  }
   0xe   : > { %849 = vmatpush3.bf16.msra.mxu1 %v899_v7  ;;  %828 = vmatprep.subr.bf16.mxu0 %v900_v8  ;;  %s1124_s25 = smov (!%p212_p4, %s770_s25), 3  ;;  %v916_v24 = vld [vmem:[%s1116_s1 + $0x70] sm:$0xff]   ;;  %v920_v28 = vld [vmem:[%s1116_s1 + $0x78] sm:$0xff]   ;;  %s1126_s12 = smov (!%p234_p5, %s944_s12), 1 }
   0xf   : > { %850 = vmatprep.subr.bf16.mxu1 %v901_v9  ;;  %v917_v25 = vld [vmem:[%s1116_s1 + $0xf0] sm:$0xff]   ;;  %s816_s26 = sshll.u32 %s1124_s25, 4  ;;  %v921_v29 = vld [vmem:[%s1116_s1 + $0xf8] sm:$0xff]   ;;  %s774_s17 = sshll.u32 %s1124_s25, 2 }
  0x10   : > { %v918_v26 = vld [vmem:[%s1116_s1 + $0x30] sm:$0xff]   ;;  %s219_s8 = scalar_lea.vmem %s1115_s0, %s816_s26  ;;  %v922_v30 = vld [vmem:[%s1116_s1 + $0x38] sm:$0xff]   ;;  %s232_s20 = scalar_lea.vmem %s1117_s2, %s774_s17 }
  0x11   : > { %829 = vmatpush3.bf16.msra.mxu0 %v902_v10  ;;  %v919_v27 = vld [vmem:[%s1116_s1 + $0xb0] sm:$0xff]   ;;  %v923_v31 = vld [vmem:[%s1116_s1 + $0xb8] sm:$0xff]   ;;  %s775_s25 = sshll.u32 %s1126_s12, 1 }
  0x12   : > { %851 = vmatpush3.bf16.msra.mxu1 %v903_v11  ;;  %830 = vmatprep.subr.bf16.mxu0 %v904_v12  ;;  %v924_v32 = vld [vmem:[%s219_s8] ss:$16 sps:$4 sm:$0xff]   ;;  %v926_v33 = vld [vmem:[%s219_s8 + $0x4] ss:$16 sps:$4 sm:$0xff]   ;;  %v927_v34 = vld [vmem:[%s219_s8 + $0x8] ss:$16 sps:$4 sm:$0xff]   ;;  %s237_s23 = scalar_lea.vmem %s1118_s3, %s775_s25 }
  0x13   : > { %852 = vmatprep.subr.bf16.mxu1 %v905_v13  ;;  %v929_v35 = vld [vmem:[%s219_s8 + $0xc] ss:$16 sps:$4 sm:$0xff]   ;;  %559 = vmatprep.mubr.bf16.mxu0 %v926_v33 }
  0x14   : > { %600 = vmatprep.mubr.bf16.mxu1 %v929_v35 }
  0x15   : > { %831 = vmatpush3.bf16.msra.mxu0 %v906_v14 }
  0x16   : > { %853 = vmatpush3.bf16.msra.mxu1 %v907_v15  ;;  %832 = vmatprep.subr.bf16.mxu0 %v908_v16 }
  0x17   : > { %854 = vmatprep.subr.bf16.mxu1 %v909_v17 }
  0x19   : > { %833 = vmatpush3.bf16.msra.mxu0 %v910_v18 }
  0x1a   : > { %855 = vmatpush3.bf16.msra.mxu1 %v911_v19  ;;  %834 = vmatprep.subr.bf16.mxu0 %v912_v20 }
  0x1b   : > { %856 = vmatprep.subr.bf16.mxu1 %v913_v21 }
  0x1d   : > { %835 = vmatpush3.bf16.msra.mxu0 %v914_v22 }
  0x1e   : > { %857 = vmatpush3.bf16.msra.mxu1 %v915_v23  ;;  %836 = vmatprep.subr.bf16.mxu0 %v916_v24 }
  0x1f   : > { %858 = vmatprep.subr.bf16.mxu1 %v917_v25 }
  0x21   : > { %837 = vmatpush3.bf16.msra.mxu0 %v918_v26 }
  0x22   : > { %859 = vmatpush3.bf16.msra.mxu1 %v919_v27  ;;  %838 = vmatprep.subr.bf16.mxu0 %v920_v28 }
  0x23   : > { %860 = vmatprep.subr.bf16.mxu1 %v921_v29 }
  0x25   : > { %839 = vmatpush3.bf16.msra.mxu0 %v922_v30 }
  0x26   : > { %861 = vmatpush3.bf16.msra.mxu1 %v923_v31 }
  0x28   : > { %560 = vmatmul.mubr.bf16.vlgmr.msra.gmra.mrb[0].mxu0 %v924_v32 }
  0x29   : > { %601 = vmatmul.mubr.bf16.vlgmr.msra.gmra.mrb[0].mxu1 %v927_v34 }
  0xfb   : > { %v840_v36 = vpop.f32.mrb[0].mxu0 }
  0xfc   : > { %v862_v37 = vpop.f32.mrb[0].mxu1  ;;  %v841_v38 = vpop.f32.mrb[1].mxu0 }
  0xfd   : > { %v842_v39 = vadd.f32 %v841_v38, %v840_v36  ;;  %v863_v40 = vpop.f32.mrb[1].mxu1  ;;  %v843_v41 = vpop.f32.mrb[2].mxu0 }
  0xfe   : > { %v864_v42 = vadd.f32 %v863_v40, %v862_v37  ;;  %v865_v43 = vpop.f32.mrb[2].mxu1  ;;  %v844_v44 = vpop.f32.mrb[3].mxu0 }
  0xff   : > { %v845_v45 = vadd.f32 %v844_v44, %v843_v41  ;;  %v866_v46 = vpop.f32.mrb[3].mxu1 }
 0x100   : > { %v603_v47 = vadd.f32 %v864_v42, %v842_v39  ;;  %v867_v48 = vadd.f32 %v866_v46, %v865_v43 }
 0x102   : > { %v606_v49 = vadd.f32 %v867_v48, %v845_v45  ;;  %v635_v50 = vmul.f32 %v603_v47, %v603_v47 }
 0x104   : > { %v822_v51 = vpack.c.bf16 %v606_v49, %v603_v47  ;;  %v628_v52 = vadd.f32 %v606_v49, %v603_v47  ;;  %v636_v53 = vmul.f32 %v606_v49, %v606_v49 }
 0x106   : > { %823 = vst [vmem:[%s232_s20] sm:$0xff] %v822_v51   ;;  %v629_v54 = vrot.slane %v628_v52, 4  ;;  %v637_v55 = vadd.f32 %v636_v53, %v635_v50 }
 0x108   : > { %v630_v56 = vadd.f32 %v629_v54, %v628_v52  ;;  %v638_v57 = vrot.slane %v637_v55, 4 }
 0x10a   : > { %v631_v58 = vrot.slane %v630_v56, 2  ;;  %v639_v59 = vadd.f32 %v638_v57, %v637_v55 }
 0x10c   : > { %v632_v60 = vadd.f32 %v631_v58, %v630_v56  ;;  %v640_v61 = vrot.slane %v639_v59, 2 }
 0x10e   : > { %v633_v62 = vrot.slane %v632_v60, 1  ;;  %v641_v63 = vadd.f32 %v640_v61, %v639_v59 }
 0x110   : > { %v642_v0 = vrot.slane %v641_v63, 1  ;;  %v634_v1 = vadd.f32 %v633_v62, %v632_v60 }
 0x112   : > { %v643_v2 = vadd.f32 %v642_v0, %v641_v63 }
 0x114   : > { %v645_v3 = vsel %vm644_vm0, %v634_v1, %v643_v2 }
 0x115   : > { %646 = vst [vmem:[%s237_s23] sm:$0x3] %v645_v3 }
 0x116 PF: > { %s14_s14 = sadd.s32 1, %s952_s14   ;;  %s1119_s12 = smov %s948_s13 }
 0x117   : > { %p11_p6 = scmp.ge.s32.totalorder %s14_s14, 4   ;;  %s1120_s13 = smov %s1122_s15 }
 0x119   :  { %13 = sbr.rel (!%p11_p6) target bundleno = 2 (0x2), region = 81 }

</bundles_post_ra>
